<compile_context>
chip_gen: v5e
topology: v5e:2x2
jax: 0.10.0
libtpu: 0.0.40
codegen_flags: <defaults>
</compile_context>

<pallas_src>
import functools

import jax
import jax.numpy as jnp
from jax.experimental import pallas as pl
from jax.experimental.pallas import tpu as pltpu

TILE_V = 256                     # merged-vocab tile (reduction axis) = MXU K per step
BAG_CHUNK = 64                   # bag rows whose membership sub-tile stays register-resident
VMEM_LIMIT = 48 * 1024 * 1024    # <= v7x 64 MiB physical; plenty of headroom on v5e/v6e


def _round_up(x, m):
    return (x + m - 1) // m * m


def _pick_bags_per_block():
    """256 fills the 256x256 MXU M dim on v6e/v7x; 128 already saturates v5e's 128x128."""
    try:
        kind = jax.devices()[0].device_kind.lower()
    except Exception:
        return 128
    return 256 if ("v6" in kind or "v7" in kind) else 128


def _merged_embbag_kernel(idx_ref, w_ref, o_ref, acc_ref, *, bag_chunk):
    """Sum-pool one block of bags against one vocab tile of the merged table.

    idx_ref : (BAGS, P) int32 VMEM; padded per-bag merged-vocab indices, -1 = pad.
    w_ref   : (TILE_V, D) bf16 vocab tile of the merged table.
    o_ref   : (BAGS, D) output block (written on the last vocab tile).
    acc_ref : (BAGS, D) f32 scratch accumulator (persists across vocab tiles).
    """
    k = pl.program_id(1)

    @pl.when(k == 0)
    def _init():
        acc_ref[...] = jnp.zeros_like(acc_ref)

    bags, pool = idx_ref.shape
    tile_v = w_ref.shape[0]
    base = k * tile_v
    # Merged-vocab ids covered by this weight tile; kept (1, TILE_V) so only the
    # compare results (not the iota) occupy (chunk, TILE_V) registers.
    lane_iota = jax.lax.broadcasted_iota(jnp.int32, (1, tile_v), 1) + base
    w_tile = w_ref[...]                                   # bf16 (TILE_V, D)

    # Build the membership-count matrix per BAG_CHUNK sub-tile so each sub-tile
    # is accumulated fully in registers across all `pool` compares and consumed
    # exactly once by the MXU (no pool read-modify-write passes over VMEM).
    for c in range(0, bags, bag_chunk):                   # static unroll
        idx_c = idx_ref[c:c + bag_chunk, :]               # (chunk, P) int32
        m = jnp.zeros((bag_chunk, tile_v), jnp.float32)   # f32 build: v5e-safe VPU
        for p in range(pool):                             # static unroll; pool small
            m = m + (idx_c[:, p:p + 1] == lane_iota).astype(jnp.float32)
        # Counts are small integers -> exact in bf16.  bf16 x bf16 is a
        # single-pass MXU matmul with f32 accumulation on all generations.
        acc_ref[c:c + bag_chunk, :] += jnp.dot(
            m.astype(jnp.bfloat16), w_tile, preferred_element_type=jnp.float32)

    @pl.when(k == pl.num_programs(1) - 1)
    def _finalize():
        o_ref[...] = acc_ref[...].astype(o_ref.dtype)


def _merged_forward(idx_all, merged_weight, *, bags_per_block, tile_v, out_dtype):
    """idx_all: [bags_pad, pool_max] int32 (-1 padded); merged_weight: [V_pad, D] bf16."""
    bags_pad, pool_max = idx_all.shape
    v_pad, emb_dim = merged_weight.shape
    assert bags_pad % bags_per_block == 0 and v_pad % tile_v == 0
    n_bag_blocks = bags_pad // bags_per_block
    n_vocab_tiles = v_pad // tile_v

    w_bytes = merged_weight.size * merged_weight.dtype.itemsize
    cost = pl.CostEstimate(
        flops=2 * bags_pad * v_pad * emb_dim,
        transcendentals=0,
        bytes_accessed=(idx_all.size * 4
                        + n_bag_blocks * w_bytes
                        + bags_pad * emb_dim * jnp.dtype(out_dtype).itemsize),
    )

    kernel = functools.partial(
        _merged_embbag_kernel, bag_chunk=min(BAG_CHUNK, bags_per_block))

    return pl.pallas_call(
        kernel,
        out_shape=jax.ShapeDtypeStruct((bags_pad, emb_dim), out_dtype),
        grid_spec=pltpu.PrefetchScalarGridSpec(
            num_scalar_prefetch=0,
            grid=(n_bag_blocks, n_vocab_tiles),
            in_specs=[
                # Padded per-bag indices: constant across the vocab (reduction) axis.
                pl.BlockSpec((bags_per_block, pool_max), lambda i, k: (i, 0)),
                # One vocab tile of the merged table per reduction step; the
                # pipeline double-buffers these DMAs and overlaps them with the MXU.
                pl.BlockSpec((tile_v, emb_dim), lambda i, k: (k, 0)),
            ],
            out_specs=pl.BlockSpec((bags_per_block, emb_dim), lambda i, k: (i, 0)),
            scratch_shapes=[pltpu.VMEM((bags_per_block, emb_dim), jnp.float32)],
        ),
        compiler_params=pltpu.CompilerParams(
            dimension_semantics=("parallel", "arbitrary"),
            vmem_limit_bytes=VMEM_LIMIT,
        ),
        cost_estimate=cost,
    )(idx_all, merged_weight)


def _pad_bag_indices(indices, offsets, pool_max, base):
    """CSR (indices, offsets) -> [batch, pool_max] padded (-1) merged-vocab indices."""
    n_idx = indices.shape[0]
    offsets = offsets.astype(jnp.int32)
    ends = jnp.concatenate([offsets[1:], jnp.full((1,), n_idx, jnp.int32)])
    counts = ends - offsets
    lane = jnp.arange(pool_max, dtype=jnp.int32)[None, :]
    pos = offsets[:, None] + lane
    valid = lane < counts[:, None]
    safe_pos = jnp.clip(pos, 0, max(n_idx - 1, 0))
    gathered = indices[safe_pos].astype(jnp.int32) + jnp.int32(base)
    return jnp.where(valid, gathered, jnp.int32(-1))


class MergedEmbAdaGradPallas:
    """Forward-only Pallas equivalent of ipex MergedEmbeddingBagWithAdaGrad."""

    def __init__(self, weights, lr=0.01, eps=1e-8, max_pooling_factor=None,
                 bags_per_block=None):
        weights = [jnp.asarray(w) for w in weights]
        dims = {int(w.shape[1]) for w in weights}
        assert len(dims) == 1, "all tables must share emb_dim"
        self.emb_dim = dims.pop()
        self.out_dtype = weights[0].dtype
        self.num_tables = len(weights)
        self.vocab_sizes = [int(w.shape[0]) for w in weights]

        self.bases, base = [], 0
        for v in self.vocab_sizes:
            self.bases.append(base)
            base += v
        self.v_total = base
        self.v_pad = _round_up(max(self.v_total, TILE_V), TILE_V)

        # Merged table stored in bf16: exact single-pass MXU operand and half the
        # HBM->VMEM traffic of f32 (numerics match DEFAULT-precision f32 matmul).
        merged = jnp.concatenate(weights, axis=0)
        merged = jnp.pad(merged, ((0, self.v_pad - self.v_total), (0, 0)))
        self.merged_weight = merged.astype(jnp.bfloat16)

        self.lr = lr
        self.eps = eps
        self.pool_max = max_pooling_factor        # static upper bound if provided
        self.bags_per_block = bags_per_block or _pick_bags_per_block()
        self._fwd = None
        # TODO(synk): AdaGrad accumulator state + sparse row update belong to the
        # backward/step path of MergedEmbeddingBagWithAdaGrad, not forward().
        # TODO(synk): per_sample_weights / padding_idx / include_last_offset are
        # not supported (the benchmark uses plain mode="sum").
        # NOTE: an index >= its own table's vocab would alias into a neighbouring
        # table's rows in the merged vocab (PyTorch would raise instead); indices
        # are assumed in-range, as in the benchmark.

    def _build_forward(self):
        num_tables, bases = self.num_tables, tuple(self.bases)
        pool_max, bpb = self.pool_max, self.bags_per_block
        emb_dim, out_dtype = self.emb_dim, self.out_dtype

        def fwd(merged_weight, indices_list, offsets_list):
            batch = offsets_list[0].shape[0]
            padded = [
                _pad_bag_indices(idx, off, pool_max, bases[t])
                for t, (idx, off) in enumerate(zip(indices_list, offsets_list))
            ]
            idx_all = jnp.concatenate(padded, axis=0)       # [T*batch, pool_max]
            total = num_tables * batch
            bags_pad = _round_up(total, bpb)
            idx_all = jnp.pad(idx_all, ((0, bags_pad - total), (0, 0)),
                              constant_values=-1)
            out = _merged_forward(idx_all, merged_weight,
                                  bags_per_block=bpb, tile_v=TILE_V,
                                  out_dtype=out_dtype)
            out = out[:total].reshape(num_tables, batch, emb_dim)
            return tuple(out[t] for t in range(num_tables))

        # One fused jit: CSR->padded indices, the pallas_call and the output
        # slicing/reshape all compile together (no per-table op launches).
        return jax.jit(fwd)

    def __call__(self, indices_list, offsets_list):
        assert len(indices_list) == self.num_tables
        assert len(offsets_list) == self.num_tables
        if self.pool_max is None:
            # Data-dependent fallback: one host sync + recompile if the max
            # pooling factor grows.  Pass max_pooling_factor to avoid this.
            pm = 1
            for idx, off in zip(indices_list, offsets_list):
                n = int(idx.shape[0])
                off = jnp.asarray(off, jnp.int32)
                ends = jnp.concatenate([off[1:], jnp.array([n], jnp.int32)])
                pm = max(pm, int(jnp.max(ends - off)))
            self.pool_max = pm
            self._fwd = None
        if self._fwd is None:
            self._fwd = self._build_forward()
        indices_list = [jnp.asarray(i, jnp.int32) for i in indices_list]
        offsets_list = [jnp.asarray(o, jnp.int32) for o in offsets_list]
        return list(self._fwd(self.merged_weight, indices_list, offsets_list))


def _ref_embeddingbag_sum(weight, indices, offsets):
    """Pure-JAX reference (PyTorch EmbeddingBag mode='sum' semantics)."""
    n = indices.shape[0]
    batch = offsets.shape[0]
    seg = jnp.searchsorted(offsets, jnp.arange(n), side="right") - 1
    return jax.ops.segment_sum(weight[indices], seg, num_segments=batch)


if __name__ == "__main__":
    key = jax.random.PRNGKey(0)

    # Synthetic "emblist": 3 embedding tables, shared embedding dim 128.
    vocab_sizes = [64, 100, 48]
    emb_dim = 128
    batch = 16
    pooling_factors = [2, 3, 5]

    weights, indices_list, offsets_list = [], [], []
    for V, pf in zip(vocab_sizes, pooling_factors):
        key, kw, ki = jax.random.split(key, 3)
        weights.append(jax.random.normal(kw, (V, emb_dim), dtype=jnp.float32) * 0.1)
        indices_list.append(
            jax.random.randint(ki, (batch * pf,), 0, V, dtype=jnp.int32))
        offsets_list.append(jnp.arange(batch, dtype=jnp.int32) * pf)

    model = MergedEmbAdaGradPallas(weights, lr=0.01, eps=1e-8,
                                   max_pooling_factor=max(pooling_factors))
    outs = model(indices_list, offsets_list)
    outs = [jax.block_until_ready(o) for o in outs]

    # Sanity-check: exact (modulo f32 accumulation order) vs a bf16-weight
    # reference, and loosely vs the f32 reference (MXU runs bf16 single-pass).
    for o, w, idx, off in zip(outs, weights, indices_list, offsets_list):
        assert o.shape == (batch, emb_dim)
        w_bf = w.astype(jnp.bfloat16).astype(jnp.float32)
        ref_bf = _ref_embeddingbag_sum(w_bf, idx, off)
        assert jnp.allclose(o, ref_bf, rtol=1e-4, atol=1e-4), "mismatch vs bf16 ref"
        ref_f32 = _ref_embeddingbag_sum(w, idx, off)
        assert jnp.allclose(o, ref_f32, rtol=3e-2, atol=3e-2), "mismatch vs f32 ref"

    print("KERNEL_OK")
</pallas_src>

<mosaic_0001>
module attributes {stable_mosaic.version = 11 : i64} {
  func.func @_merged_embbag_kernel(%arg0: i32, %arg1: i32, %arg2: memref<128x5xi32, #tpu.memory_space<vmem>>, %arg3: memref<256x128xbf16, #tpu.memory_space<vmem>>, %arg4: memref<128x128xf32, #tpu.memory_space<vmem>>, %arg5: memref<128x128xf32, #tpu.memory_space<vmem>>) attributes {dimension_semantics = [#tpu.dimension_semantics<parallel>, #tpu.dimension_semantics<arbitrary>], iteration_bounds = array<i64: 1, 1>, scalar_prefetch = 0 : i64, scratch_operands = 1 : i64, tpu.core_type = #tpu.core_type<tc>, window_params = [{transform_indices = @transform_0, window_bounds = array<i64: 128, 5>}, {transform_indices = @transform_1, window_bounds = array<i64: 256, 128>}, {transform_indices = @transform_2, window_bounds = array<i64: 128, 128>}]} {
    %c0_i32 = arith.constant 0 : i32
    %0 = arith.cmpi eq, %arg1, %c0_i32 : i32
    %1 = arith.extui %0 : i1 to i32
    %c0_i32_0 = arith.constant 0 : i32
    %2 = arith.cmpi ne, %1, %c0_i32_0 : i32
    scf.if %2 {
      %cst_18 = arith.constant 0.000000e+00 : f32
      %95 = vector.broadcast %cst_18 : f32 to vector<128x128xf32>
      %c0_19 = arith.constant 0 : index
      %c0_20 = arith.constant 0 : index
      %96 = vector.load %arg5[%c0_19, %c0_20] : memref<128x128xf32, #tpu.memory_space<vmem>>, vector<128x128xf32>
      tpu.vector_store %arg5[%c0_19, %c0_20], %95 {strides = array<i32>} : memref<128x128xf32, #tpu.memory_space<vmem>>, vector<128x128xf32>,
    } else {
    }
    %c256_i32 = arith.constant 256 : i32
    %3 = arith.muli %arg1, %c256_i32 : i32
    %4 = tpu.iota {dimensions = array<i32: 1>} : vector<1x256xi32>
    %5 = vector.broadcast %3 : i32 to vector<1x256xi32>
    %6 = arith.addi %4, %5 : vector<1x256xi32>
    %c0 = arith.constant 0 : index
    %c0_1 = arith.constant 0 : index
    %7 = vector.load %arg3[%c0, %c0_1] : memref<256x128xbf16, #tpu.memory_space<vmem>>, vector<256x128xbf16>
    %c0_2 = arith.constant 0 : index
    %c0_3 = arith.constant 0 : index
    %8 = vector.load %arg2[%c0_2, %c0_3] : memref<128x5xi32, #tpu.memory_space<vmem>>, vector<64x5xi32>
    %cst = arith.constant 0.000000e+00 : f32
    %9 = vector.broadcast %cst : f32 to vector<64x256xf32>
    %10 = vector.extract_strided_slice %8 {offsets = [0, 0], sizes = [64, 1], strides = [1, 1]} : vector<64x5xi32> to vector<64x1xi32>
    %11 = vector.broadcast %10 : vector<64x1xi32> to vector<64x256xi32>
    %12 = vector.broadcast %6 : vector<1x256xi32> to vector<64x256xi32>
    %13 = arith.cmpi eq, %11, %12 : vector<64x256xi32>
    %14 = arith.extui %13 : vector<64x256xi1> to vector<64x256xi32>
    %15 = arith.sitofp %14 : vector<64x256xi32> to vector<64x256xf32>
    %16 = arith.addf %9, %15 : vector<64x256xf32>
    %17 = vector.extract_strided_slice %8 {offsets = [0, 1], sizes = [64, 1], strides = [1, 1]} : vector<64x5xi32> to vector<64x1xi32>
    %18 = vector.broadcast %17 : vector<64x1xi32> to vector<64x256xi32>
    %19 = vector.broadcast %6 : vector<1x256xi32> to vector<64x256xi32>
    %20 = arith.cmpi eq, %18, %19 : vector<64x256xi32>
    %21 = arith.extui %20 : vector<64x256xi1> to vector<64x256xi32>
    %22 = arith.sitofp %21 : vector<64x256xi32> to vector<64x256xf32>
    %23 = arith.addf %16, %22 : vector<64x256xf32>
    %24 = vector.extract_strided_slice %8 {offsets = [0, 2], sizes = [64, 1], strides = [1, 1]} : vector<64x5xi32> to vector<64x1xi32>
    %25 = vector.broadcast %24 : vector<64x1xi32> to vector<64x256xi32>
    %26 = vector.broadcast %6 : vector<1x256xi32> to vector<64x256xi32>
    %27 = arith.cmpi eq, %25, %26 : vector<64x256xi32>
    %28 = arith.extui %27 : vector<64x256xi1> to vector<64x256xi32>
    %29 = arith.sitofp %28 : vector<64x256xi32> to vector<64x256xf32>
    %30 = arith.addf %23, %29 : vector<64x256xf32>
    %31 = vector.extract_strided_slice %8 {offsets = [0, 3], sizes = [64, 1], strides = [1, 1]} : vector<64x5xi32> to vector<64x1xi32>
    %32 = vector.broadcast %31 : vector<64x1xi32> to vector<64x256xi32>
    %33 = vector.broadcast %6 : vector<1x256xi32> to vector<64x256xi32>
    %34 = arith.cmpi eq, %32, %33 : vector<64x256xi32>
    %35 = arith.extui %34 : vector<64x256xi1> to vector<64x256xi32>
    %36 = arith.sitofp %35 : vector<64x256xi32> to vector<64x256xf32>
    %37 = arith.addf %30, %36 : vector<64x256xf32>
    %38 = vector.extract_strided_slice %8 {offsets = [0, 4], sizes = [64, 1], strides = [1, 1]} : vector<64x5xi32> to vector<64x1xi32>
    %39 = vector.broadcast %38 : vector<64x1xi32> to vector<64x256xi32>
    %40 = vector.broadcast %6 : vector<1x256xi32> to vector<64x256xi32>
    %41 = arith.cmpi eq, %39, %40 : vector<64x256xi32>
    %42 = arith.extui %41 : vector<64x256xi1> to vector<64x256xi32>
    %43 = arith.sitofp %42 : vector<64x256xi32> to vector<64x256xf32>
    %44 = arith.addf %37, %43 : vector<64x256xf32>
    %c0_4 = arith.constant 0 : index
    %c0_5 = arith.constant 0 : index
    %45 = vector.load %arg5[%c0_4, %c0_5] : memref<128x128xf32, #tpu.memory_space<vmem>>, vector<64x128xf32>
    %46 = arith.truncf %44 : vector<64x256xf32> to vector<64x256xbf16>
    %cst_6 = arith.constant dense<0.000000e+00> : vector<64x128xf32>
    %47 = tpu.matmul %46, %7, %cst_6 {dimension_numbers = #tpu.dot_dimension_numbers<[1], [0], [0], [1], [0, 0, 1, 1], [], []>} : vector<64x256xbf16>, vector<256x128xbf16>, vector<64x128xf32> -> vector<64x128xf32>
    %48 = arith.addf %45, %47 : vector<64x128xf32>
    %c0_7 = arith.constant 0 : index
    %c0_8 = arith.constant 0 : index
    %49 = vector.load %arg5[%c0_7, %c0_8] : memref<128x128xf32, #tpu.memory_space<vmem>>, vector<64x128xf32>
    tpu.vector_store %arg5[%c0_7, %c0_8], %48 {strides = array<i32>} : memref<128x128xf32, #tpu.memory_space<vmem>>, vector<64x128xf32>,
    %c64 = arith.constant 64 : index
    %c0_9 = arith.constant 0 : index
    %50 = vector.load %arg2[%c64, %c0_9] : memref<128x5xi32, #tpu.memory_space<vmem>>, vector<64x5xi32>
    %cst_10 = arith.constant 0.000000e+00 : f32
    %51 = vector.broadcast %cst_10 : f32 to vector<64x256xf32>
    %52 = vector.extract_strided_slice %50 {offsets = [0, 0], sizes = [64, 1], strides = [1, 1]} : vector<64x5xi32> to vector<64x1xi32>
    %53 = vector.broadcast %52 : vector<64x1xi32> to vector<64x256xi32>
    %54 = vector.broadcast %6 : vector<1x256xi32> to vector<64x256xi32>
    %55 = arith.cmpi eq, %53, %54 : vector<64x256xi32>
    %56 = arith.extui %55 : vector<64x256xi1> to vector<64x256xi32>
    %57 = arith.sitofp %56 : vector<64x256xi32> to vector<64x256xf32>
    %58 = arith.addf %51, %57 : vector<64x256xf32>
    %59 = vector.extract_strided_slice %50 {offsets = [0, 1], sizes = [64, 1], strides = [1, 1]} : vector<64x5xi32> to vector<64x1xi32>
    %60 = vector.broadcast %59 : vector<64x1xi32> to vector<64x256xi32>
    %61 = vector.broadcast %6 : vector<1x256xi32> to vector<64x256xi32>
    %62 = arith.cmpi eq, %60, %61 : vector<64x256xi32>
    %63 = arith.extui %62 : vector<64x256xi1> to vector<64x256xi32>
    %64 = arith.sitofp %63 : vector<64x256xi32> to vector<64x256xf32>
    %65 = arith.addf %58, %64 : vector<64x256xf32>
    %66 = vector.extract_strided_slice %50 {offsets = [0, 2], sizes = [64, 1], strides = [1, 1]} : vector<64x5xi32> to vector<64x1xi32>
    %67 = vector.broadcast %66 : vector<64x1xi32> to vector<64x256xi32>
    %68 = vector.broadcast %6 : vector<1x256xi32> to vector<64x256xi32>
    %69 = arith.cmpi eq, %67, %68 : vector<64x256xi32>
    %70 = arith.extui %69 : vector<64x256xi1> to vector<64x256xi32>
    %71 = arith.sitofp %70 : vector<64x256xi32> to vector<64x256xf32>
    %72 = arith.addf %65, %71 : vector<64x256xf32>
    %73 = vector.extract_strided_slice %50 {offsets = [0, 3], sizes = [64, 1], strides = [1, 1]} : vector<64x5xi32> to vector<64x1xi32>
    %74 = vector.broadcast %73 : vector<64x1xi32> to vector<64x256xi32>
    %75 = vector.broadcast %6 : vector<1x256xi32> to vector<64x256xi32>
    %76 = arith.cmpi eq, %74, %75 : vector<64x256xi32>
    %77 = arith.extui %76 : vector<64x256xi1> to vector<64x256xi32>
    %78 = arith.sitofp %77 : vector<64x256xi32> to vector<64x256xf32>
    %79 = arith.addf %72, %78 : vector<64x256xf32>
    %80 = vector.extract_strided_slice %50 {offsets = [0, 4], sizes = [64, 1], strides = [1, 1]} : vector<64x5xi32> to vector<64x1xi32>
    %81 = vector.broadcast %80 : vector<64x1xi32> to vector<64x256xi32>
    %82 = vector.broadcast %6 : vector<1x256xi32> to vector<64x256xi32>
    %83 = arith.cmpi eq, %81, %82 : vector<64x256xi32>
    %84 = arith.extui %83 : vector<64x256xi1> to vector<64x256xi32>
    %85 = arith.sitofp %84 : vector<64x256xi32> to vector<64x256xf32>
    %86 = arith.addf %79, %85 : vector<64x256xf32>
    %c64_11 = arith.constant 64 : index
    %c0_12 = arith.constant 0 : index
    %87 = vector.load %arg5[%c64_11, %c0_12] : memref<128x128xf32, #tpu.memory_space<vmem>>, vector<64x128xf32>
    %88 = arith.truncf %86 : vector<64x256xf32> to vector<64x256xbf16>
    %cst_13 = arith.constant dense<0.000000e+00> : vector<64x128xf32>
    %89 = tpu.matmul %88, %7, %cst_13 {dimension_numbers = #tpu.dot_dimension_numbers<[1], [0], [0], [1], [0, 0, 1, 1], [], []>} : vector<64x256xbf16>, vector<256x128xbf16>, vector<64x128xf32> -> vector<64x128xf32>
    %90 = arith.addf %87, %89 : vector<64x128xf32>
    %c64_14 = arith.constant 64 : index
    %c0_15 = arith.constant 0 : index
    %91 = vector.load %arg5[%c64_14, %c0_15] : memref<128x128xf32, #tpu.memory_space<vmem>>, vector<64x128xf32>
    tpu.vector_store %arg5[%c64_14, %c0_15], %90 {strides = array<i32>} : memref<128x128xf32, #tpu.memory_space<vmem>>, vector<64x128xf32>,
    %c0_i32_16 = arith.constant 0 : i32
    %92 = arith.cmpi eq, %arg1, %c0_i32_16 : i32
    %93 = arith.extui %92 : i1 to i32
    %c0_i32_17 = arith.constant 0 : i32
    %94 = arith.cmpi ne, %93, %c0_i32_17 : i32
    scf.if %94 {
      %c0_18 = arith.constant 0 : index
      %c0_19 = arith.constant 0 : index
      %95 = vector.load %arg5[%c0_18, %c0_19] : memref<128x128xf32, #tpu.memory_space<vmem>>, vector<128x128xf32>
      %c0_20 = arith.constant 0 : index
      %c0_21 = arith.constant 0 : index
      %96 = vector.load %arg4[%c0_20, %c0_21] : memref<128x128xf32, #tpu.memory_space<vmem>>, vector<128x128xf32>
      tpu.vector_store %arg4[%c0_20, %c0_21], %95 {strides = array<i32>} : memref<128x128xf32, #tpu.memory_space<vmem>>, vector<128x128xf32>,
    } else {
    }
    return
  }
  func.func @transform_0(%arg0: i32, %arg1: i32) -> (i32, i32) {
    %c0_i32 = arith.constant 0 : i32
    %c0_i32_0 = arith.constant 0 : i32
    return %arg0, %c0_i32 : i32, i32
  }
  func.func @transform_1(%arg0: i32, %arg1: i32) -> (i32, i32) {
    %c0_i32 = arith.constant 0 : i32
    %c0_i32_0 = arith.constant 0 : i32
    return %arg1, %c0_i32 : i32, i32
  }
  func.func @transform_2(%arg0: i32, %arg1: i32) -> (i32, i32) {
    %c0_i32 = arith.constant 0 : i32
    %c0_i32_0 = arith.constant 0 : i32
    return %arg0, %c0_i32 : i32, i32
  }
}

</mosaic_0001>

<bundles_post_ra>
// kernel: fwd.1
= control target key start
LH: loop header
LB: loop body
LE: loop exit
PB: predicated region body
PF: predicated region fallthrough
CT: control target
= control target key end

     0   :  { %v1577_v0 = vmov 1   ;;  %v1578_v1 = vmov 0   ;;  %v1579_v10 = vmov 2   ;;  %v1580_v11 = vmov 4   ;;  %s2401_s0 = inlined_call_operand.vmem [shape: s32[128,5], index: 0, kind: input, shape index: {}]   ;;  %s2402_s1 = inlined_call_operand.vmem [shape: bf16[256,128], index: 1, kind: input, shape index: {}]   ;;  %s2403_s2 = inlined_call_operand.vmem [shape: f32[128,128], index: 2, kind: output, shape index: {}]  }
   0x1   :  { %1530 = vset.pattern.permute.xlu0 %v1577_v0  ;;  %1528 = vset.pattern.permute.xlu2 %v1578_v1  ;;  %v1603_v2 = vld [vmem:[%s2401_s0 + $0x20] sm:$0xff]  ;;  %v72_v3 = vld [vmem:[%s2401_s0 + $0x10] sm:$0xff]  ;;  %v71_v4 = vld [vmem:[%s2401_s0 + $0x8] sm:$0xff]  ;;  %v1581_v12 = vmov 3   ;;  %v32_v19 = vlaneseq  ;;  %v1582_v25 = vmov 0.0  }
   0x2   :  { %1527 = vset.pattern.permute.xlu1 %v1578_v1  ;;  %91 = vperm.xlu2 %1528, %v1603_v2   ;;  %v1616_v5 = vld [vmem:[%s2401_s0 + $0x28] sm:$0xff]  ;;  %v73_v6 = vld [vmem:[%s2401_s0 + $0x18] sm:$0xff]  ;;  %v76_v7 = vld [vmem:[%s2401_s0 + $0x30] sm:$0xff] }
   0x3   :  { %85 = vperm.xlu1 %1527, %v72_v3   ;;  %170 = vperm.xlu0 %1530, %v71_v4   ;;  %v1628_v8 = vld [vmem:[%s2401_s0 + $0x38] sm:$0xff]  ;;  %v70_v9 = vld [vmem:[%s2401_s0] sm:$0xff]  ;;  %v1651_v13 = vld [vmem:[%s2401_s0 + $0x48] sm:$0xff]  ;;  %v1679_v20 = vand.u32 127, %v32_v19 }
   0x4   :  { %v1658_v14 = vld [vmem:[%s2401_s0 + $0x58] sm:$0xff]  ;;  %v1674_v18 = vld [vmem:[%s2401_s0 + $0x40] sm:$0xff]  ;;  %v1722_v41 = vld [vmem:[%s2401_s0 + $0x50] sm:$0xff] }
   0x5   :  { %v1685_v24 = vadd.s32 128, %v1679_v20  ;;  %v1512_v62 = vld [vmem:[%s2402_s1 + $0x38] sm:$0xff]  ;;  %v1518_v19 = vld [vmem:[%s2402_s1 + $0x68] sm:$0xff] }
   0x6   :  { %v1520_v63 = vld [vmem:[%s2402_s1 + $0x78] sm:$0xff]  ;;  %630 = vmatpush.bf16.msra.mxu0 %v1512_v62  ;;  %1168 = vmatpush.bf16.msra.mxu2 %v1512_v62 }
   0x7   :  { %659 = vmatpush.bf16.msra.mxu1 %v1520_v63  ;;  %1197 = vmatpush.bf16.msra.mxu3 %v1520_v63 }
   0xa   :  { %94 = vperm.xlu2 %1528, %v1616_v5  }
   0xb   :  { %88 = vperm.xlu1 %1527, %v73_v6   ;;  %185 = vperm.xlu0 %1530, %v76_v7  }
  0x12   :  { %1529 = vset.pattern.permute.xlu2 %v1577_v0 }
  0x13   :  { %100 = vperm.xlu1 %1527, %v1628_v8   ;;  %1533 = vset.pattern.permute.xlu0 %v1579_v10 }
  0x14   :  { %258 = vperm.xlu0 %1533, %v71_v4   ;;  %167 = vperm.xlu2 %1529, %v70_v9  }
  0x1b   :  { %1531 = vset.pattern.permute.xlu1 %v1577_v0 }
  0x1c   :  { %173 = vperm.xlu1 %1531, %v72_v3   ;;  %273 = vperm.xlu0 %1533, %v76_v7  }
  0x1d   :  { %176 = vperm.xlu2 %1529, %v73_v6  }
  0x24   :  { %179 = vperm.xlu1 %1531, %v1603_v2   ;;  %1538 = vset.pattern.permute.xlu0 %v1580_v11 }
  0x25   :  { %182 = vperm.xlu2 %1529, %v1616_v5   ;;  %434 = vperm.xlu0 %1538, %v71_v4  }
  0x2c   :  { %188 = vperm.xlu1 %1531, %v1628_v8  }
  0x2d   :  { %1532 = vset.pattern.permute.xlu2 %v1579_v10  ;;  %449 = vperm.xlu0 %1538, %v76_v7  }
  0x2e   :  { %255 = vperm.xlu2 %1532, %v70_v9  }
  0x34   :  { %1534 = vset.pattern.permute.xlu1 %v1579_v10 }
  0x35   :  { %261 = vperm.xlu1 %1534, %v72_v3   ;;  %1540 = vset.pattern.permute.xlu0 %v1578_v1 }
  0x36   :  { %264 = vperm.xlu2 %1532, %v73_v6   ;;  %79 = vperm.xlu0 %1540, %v70_v9  }
  0x3d   :  { %267 = vperm.xlu1 %1534, %v1603_v2  }
  0x3e   :  { %270 = vperm.xlu2 %1532, %v1616_v5   ;;  %82 = vperm.xlu0 %1540, %v71_v4  }
  0x45   :  { %276 = vperm.xlu1 %1534, %v1628_v8  }
  0x46   :  { %1535 = vset.pattern.permute.xlu2 %v1581_v12  ;;  %97 = vperm.xlu0 %1540, %v76_v7  }
  0x47   :  { %343 = vperm.xlu2 %1535, %v70_v9  }
  0x4d   :  { %1536 = vset.pattern.permute.xlu1 %v1581_v12 }
  0x4e   :  { %349 = vperm.xlu1 %1536, %v72_v3   ;;  %716 = vperm.xlu0 %1540, %v1651_v13  }
  0x4f   :  { %352 = vperm.xlu2 %1535, %v73_v6  }
  0x56   :  { %355 = vperm.xlu1 %1536, %v1603_v2   ;;  %722 = vperm.xlu0 %1540, %v1658_v14  }
  0x57   :  { %358 = vperm.xlu2 %1535, %v1616_v5  }
  0x5c   :  { %v1663_v15 = vpop.permute.xlu2 %91 }
  0x5d   :  { %vm110_vm12 = vcmp.eq.s32.totalorder %v1663_v15, %v1679_v20  ;;  %vm111_vm13 = vcmp.eq.s32.totalorder %v1663_v15, %v1685_v24 }
  0x5e   :  { %364 = vperm.xlu1 %1536, %v1628_v8   ;;  %1550 = vset.pattern.permute.xlu0 %v1581_v12  ;;  %v1289_v56 = vsel %vm110_vm12, 1.0, %v1582_v25  ;;  %v1290_v57 = vsel %vm111_vm13, 1.0, %v1582_v25 }
  0x5f   :  { %1537 = vset.pattern.permute.xlu2 %v1580_v11  ;;  %346 = vperm.xlu0 %1550, %v71_v4   ;;  %v1511_v4 = vld [vmem:[%s2402_s1 + $0x30] sm:$0xff] }
  0x60   :  { %431 = vperm.xlu2 %1537, %v70_v9   ;;  %631 = vmatpush.bf16.msra.mxu0 %v1511_v4 }
  0x61   :  { %1169 = vmatpush.bf16.msra.mxu2 %v1511_v4 }
  0x64   :  { %v95_v16 = vpop.permute.xlu2 %94 }
  0x65   :  { %vm112_vm2 = vcmp.eq.s32.totalorder %v95_v16, %v1679_v20  ;;  %vm113_vm3 = vcmp.eq.s32.totalorder %v95_v16, %v1685_v24 }
  0x66   :  { %1539 = vset.pattern.permute.xlu1 %v1580_v11  ;;  %v1291_v30 = vsel %vm112_vm2, 1.0, %v1582_v25  ;;  %v1292_v31 = vsel %vm113_vm3, 1.0, %v1582_v25 }
  0x67   :  { %437 = vperm.xlu1 %1539, %v72_v3   ;;  %361 = vperm.xlu0 %1550, %v76_v7  }
  0x68   :  { %440 = vperm.xlu2 %1537, %v73_v6  }
  0x6e   :  { %v1669_v17 = vpop.permute.xlu2 %167 }
  0x6f   :  { %443 = vperm.xlu1 %1539, %v1603_v2   ;;  %977 = vperm.xlu0 %1550, %v1674_v18  }
  0x70   :  { %446 = vperm.xlu2 %1537, %v1616_v5   ;;  %v1519_v5 = vld [vmem:[%s2402_s1 + $0x70] sm:$0xff] }
  0x71   :  { %660 = vmatpush.bf16.msra.mxu1 %v1519_v5  ;;  %1198 = vmatpush.bf16.msra.mxu3 %v1519_v5 }
  0x75   :  { %v86_v21 = vpop.permute.xlu1 %85  ;;  %v1681_v22 = vpop.permute.xlu0 %170  ;;  %661 = vmatpush.bf16.msra.mxu1 %v1518_v19  ;;  %1199 = vmatpush.bf16.msra.mxu3 %v1518_v19 }
  0x76   :  { %vm106_vm8 = vcmp.eq.s32.totalorder %v86_v21, %v1679_v20  ;;  %vm107_vm9 = vcmp.eq.s32.totalorder %v86_v21, %v1685_v24  ;;  %v1812_v21 = vld [vmem:[%s2401_s0 + $0x60] sm:$0xff] }
  0x77   :  { %v177_v23 = vpop.permute.xlu2 %176  ;;  %452 = vperm.xlu1 %1539, %v1628_v8   ;;  %983 = vperm.xlu0 %1550, %v1722_v41   ;;  %v1285_v47 = vsel %vm106_vm8, 1.0, %v1582_v25  ;;  %v1286_v48 = vsel %vm107_vm9, 1.0, %v1582_v25 }
  0x78   :  { %1541 = vset.pattern.permute.xlu2 %v1578_v1  ;;  %vm196_vm0 = vcmp.eq.s32.totalorder %v177_v23, %v1679_v20  ;;  %vm197_vm1 = vcmp.eq.s32.totalorder %v177_v23, %v1685_v24  ;;  %v1509_v23 = vld [vmem:[%s2402_s1 + $0x20] sm:$0xff] }
  0x79   :  { %713 = vperm.xlu2 %1541, %v1674_v18   ;;  %v1303_v26 = vsel %vm196_vm0, 1.0, %v1582_v25  ;;  %v1304_v27 = vsel %vm197_vm1, 1.0, %v1582_v25 }
  0x7d   :  { %v89_v28 = vpop.permute.xlu1 %88  ;;  %v1695_v29 = vpop.permute.xlu0 %185 }
  0x7e   :  { %vm108_vm4 = vcmp.eq.s32.totalorder %v89_v28, %v1679_v20  ;;  %vm109_vm5 = vcmp.eq.s32.totalorder %v89_v28, %v1685_v24 }
  0x7f   :  { %v1287_v32 = vsel %vm108_vm4, 1.0, %v1582_v25  ;;  %v1288_v33 = vsel %vm109_vm5, 1.0, %v1582_v25  ;;  %v183_v34 = vpop.permute.xlu2 %182  ;;  %1542 = vset.pattern.permute.xlu1 %v1577_v0  ;;  %989 = vperm.xlu0 %1550, %v1812_v21   ;;  %vm192_vm4 = vcmp.eq.s32.totalorder %v1681_v22, %v1679_v20  ;;  %vm193_vm5 = vcmp.eq.s32.totalorder %v1681_v22, %v1685_v24 }
  0x80   :  { %v1704_v35 = vadd.f32 %v1303_v26, %v1287_v32  ;;  %v1706_v36 = vadd.f32 %v1304_v27, %v1288_v33  ;;  %vm200_vm6 = vcmp.eq.s32.totalorder %v183_v34, %v1679_v20  ;;  %vm201_vm7 = vcmp.eq.s32.totalorder %v183_v34, %v1685_v24  ;;  %801 = vperm.xlu1 %1542, %v1674_v18   ;;  %v1517_v26 = vld [vmem:[%s2402_s1 + $0x60] sm:$0xff]  ;;  %v1516_v32 = vld [vmem:[%s2402_s1 + $0x58] sm:$0xff]  ;;  %v1507_v33 = vld [vmem:[%s2402_s1 + $0x10] sm:$0xff] }
  0x81   :  { %v1307_v37 = vsel %vm200_vm6, 1.0, %v1582_v25  ;;  %v1308_v38 = vsel %vm201_vm7, 1.0, %v1582_v25  ;;  %1543 = vset.pattern.permute.xlu2 %v1577_v0  ;;  %662 = vmatpush.bf16.msra.mxu1 %v1517_v26 }
  0x82   :  { %v1714_v39 = vadd.f32 %v1307_v37, %v1291_v30  ;;  %v1716_v40 = vadd.f32 %v1308_v38, %v1292_v31  ;;  %804 = vperm.xlu2 %1543, %v1651_v13   ;;  %v1508_v31 = vld [vmem:[%s2402_s1 + $0x18] sm:$0xff]  ;;  %1200 = vmatpush.bf16.msra.mxu3 %v1517_v26  ;;  %v1515_v37 = vld [vmem:[%s2402_s1 + $0x50] sm:$0xff]  ;;  %v1299_v38 = vsel %vm192_vm4, 1.0, %v1582_v25 }
  0x85   :  { %v101_v42 = vpop.permute.xlu1 %100  ;;  %663 = vmatpush.bf16.msra.mxu1 %v1516_v32 }
  0x86   :  { %v1725_v43 = vpop.permute.xlu0 %258  ;;  %vm116_vm0 = vcmp.eq.s32.totalorder %v101_v42, %v1679_v20  ;;  %vm117_vm1 = vcmp.eq.s32.totalorder %v101_v42, %v1685_v24  ;;  %v1300_v42 = vsel %vm193_vm5, 1.0, %v1582_v25  ;;  %1201 = vmatpush.bf16.msra.mxu3 %v1516_v32 }
  0x87   :  { %v1295_v7 = vsel %vm116_vm0, 1.0, %v1582_v25  ;;  %v1296_v8 = vsel %vm117_vm1, 1.0, %v1582_v25  ;;  %vm280_vm6 = vcmp.eq.s32.totalorder %v1725_v43, %v1679_v20  ;;  %vm281_vm7 = vcmp.eq.s32.totalorder %v1725_v43, %v1685_v24  ;;  %1563 = vset.pattern.permute.xlu0 %v1578_v1  ;;  %v1865_v43 = vld [vmem:[%s2401_s0 + $0x68] sm:$0xff] }
  0x88   :  { %1544 = vset.pattern.permute.xlu1 %v1579_v10  ;;  %v1729_v44 = vpop.permute.xlu2 %255  ;;  %728 = vperm.xlu0 %1563, %v1865_v43  }
  0x89   :  { %889 = vperm.xlu1 %1544, %v1674_v18   ;;  %664 = vmatpush.bf16.msra.mxu1 %v1515_v37 }
  0x8a   :  { %1545 = vset.pattern.permute.xlu2 %v1579_v10  ;;  %1202 = vmatpush.bf16.msra.mxu3 %v1515_v37 }
  0x8b   :  { %892 = vperm.xlu2 %1545, %v1651_v13  }
  0x8e   :  { %v174_v45 = vpop.permute.xlu1 %173  ;;  %v1735_v46 = vpop.permute.xlu0 %273 }
  0x8f   :  { %vm194_vm10 = vcmp.eq.s32.totalorder %v174_v45, %v1679_v20  ;;  %vm195_vm11 = vcmp.eq.s32.totalorder %v174_v45, %v1685_v24  ;;  %vm290_vm12 = vcmp.eq.s32.totalorder %v1735_v46, %v1679_v20  ;;  %vm291_vm13 = vcmp.eq.s32.totalorder %v1735_v46, %v1685_v24  ;;  %v1513_v46 = vld [vmem:[%s2402_s1 + $0x40] sm:$0xff] }
  0x90   :  { %v1301_v49 = vsel %vm194_vm10, 1.0, %v1582_v25  ;;  %v1302_v50 = vsel %vm195_vm11, 1.0, %v1582_v25  ;;  %v1750_v53 = vpop.permute.xlu2 %264  ;;  %vm202_vm10 = vcmp.eq.s32.totalorder %v1695_v29, %v1679_v20  ;;  %vm203_vm11 = vcmp.eq.s32.totalorder %v1695_v29, %v1685_v24  ;;  %v1505_v29 = vld [vmem:[%s2402_s1] sm:$0xff] }
  0x91   :  { %v1743_v51 = vadd.f32 %v1301_v49, %v1285_v47  ;;  %v1745_v52 = vadd.f32 %v1302_v50, %v1286_v48  ;;  %1546 = vset.pattern.permute.xlu1 %v1581_v12  ;;  %v1315_v47 = vsel %vm280_vm6, 1.0, %v1582_v25  ;;  %v1316_v48 = vsel %vm281_vm7, 1.0, %v1582_v25 }
  0x92   :  { %980 = vperm.xlu1 %1546, %v1651_v13   ;;  %v1309_v63 = vsel %vm202_vm10, 1.0, %v1582_v25  ;;  %v1325_v5 = vsel %vm290_vm12, 1.0, %v1582_v25  ;;  %vm284_vm6 = vcmp.eq.s32.totalorder %v1750_v53, %v1679_v20  ;;  %vm285_vm7 = vcmp.eq.s32.totalorder %v1750_v53, %v1685_v24 }
  0x93   :  { %1547 = vset.pattern.permute.xlu2 %v1580_v11 }
  0x94   :  { %1065 = vperm.xlu2 %1547, %v1674_v18   ;;  %v1510_v18 = vld [vmem:[%s2402_s1 + $0x28] sm:$0xff] }
  0x95   :  { %632 = vmatpush.bf16.msra.mxu0 %v1510_v18  ;;  %1170 = vmatpush.bf16.msra.mxu2 %v1510_v18 }
  0x96   :  { %v180_v54 = vpop.permute.xlu1 %179 }
  0x97   :  { %vm198_vm14 = vcmp.eq.s32.totalorder %v180_v54, %v1679_v20  ;;  %vm199_vm15 = vcmp.eq.s32.totalorder %v180_v54, %v1685_v24  ;;  %v1759_v55 = vpop.permute.xlu0 %434  ;;  %v1506_v54 = vld [vmem:[%s2402_s1 + $0x8] sm:$0xff] }
  0x98   :  { %v1305_v58 = vsel %vm198_vm14, 1.0, %v1582_v25  ;;  %v1306_v59 = vsel %vm199_vm15, 1.0, %v1582_v25  ;;  %v1781_v2 = vpop.permute.xlu2 %270  ;;  %vm456_vm12 = vcmp.eq.s32.totalorder %v1759_v55, %v1679_v20 }
  0x99   :  { %v1765_v60 = vadd.f32 %v1305_v58, %v1289_v56  ;;  %v1767_v61 = vadd.f32 %v1306_v59, %v1290_v57  ;;  %633 = vmatpush.bf16.msra.mxu0 %v1509_v23  ;;  %1171 = vmatpush.bf16.msra.mxu2 %v1509_v23  ;;  %v1514_v56 = vld [vmem:[%s2402_s1 + $0x48] sm:$0xff]  ;;  %vm288_vm10 = vcmp.eq.s32.totalorder %v1781_v2, %v1679_v20 }
  0x9a   :  { %1548 = vset.pattern.permute.xlu1 %v1580_v11  ;;  %665 = vmatpush.bf16.msra.mxu1 %v1514_v56 }
  0x9b   :  { %1068 = vperm.xlu1 %1548, %v1651_v13   ;;  %1203 = vmatpush.bf16.msra.mxu3 %v1514_v56 }
  0x9c   :  { %1549 = vset.pattern.permute.xlu2 %v1578_v1 }
  0x9d   :  { %719 = vperm.xlu2 %1549, %v1722_v41   ;;  %634 = vmatpush.bf16.msra.mxu0 %v1508_v31 }
  0x9e   :  { %v189_v3 = vpop.permute.xlu1 %188  ;;  %1172 = vmatpush.bf16.msra.mxu2 %v1508_v31  ;;  %666 = vmatpush.bf16.msra.mxu1 %v1513_v46 }
  0x9f   :  { %vm204_vm2 = vcmp.eq.s32.totalorder %v189_v3, %v1679_v20  ;;  %vm205_vm3 = vcmp.eq.s32.totalorder %v189_v3, %v1685_v24  ;;  %v1791_v6 = vpop.permute.xlu0 %449  ;;  %v1310_v3 = vsel %vm203_vm11, 1.0, %v1582_v25  ;;  %1204 = vmatpush.bf16.msra.mxu3 %v1513_v46  ;;  %vm289_vm11 = vcmp.eq.s32.totalorder %v1781_v2, %v1685_v24  ;;  %v2007_v2 = vld [vmem:[%s2401_s0 + $0x78] sm:$0xff] }
  0xa0   :  { %v1311_v9 = vsel %vm204_vm2, 1.0, %v1582_v25  ;;  %v1312_v13 = vsel %vm205_vm3, 1.0, %v1582_v25  ;;  %vm190_vm2 = vcmp.eq.s32.totalorder %v1669_v17, %v1679_v20  ;;  %vm191_vm3 = vcmp.eq.s32.totalorder %v1669_v17, %v1685_v24  ;;  %734 = vperm.xlu0 %1563, %v2007_v2  }
  0xa1   :  { %v1797_v15 = vadd.f32 %v1311_v9, %v1295_v7  ;;  %v1799_v16 = vadd.f32 %v1312_v13, %v1296_v8  ;;  %v1825_v28 = vpop.permute.xlu2 %343  ;;  %635 = vmatpush.bf16.msra.mxu0 %v1507_v33  ;;  %v1326_v7 = vsel %vm291_vm13, 1.0, %v1582_v25  ;;  %v1298_v17 = vsel %vm191_vm3, 1.0, %v1582_v25 }
  0xa2   :  { %1173 = vmatpush.bf16.msra.mxu2 %v1507_v33  ;;  %vm457_vm13 = vcmp.eq.s32.totalorder %v1759_v55, %v1685_v24  ;;  %vm467_vm3 = vcmp.eq.s32.totalorder %v1791_v6, %v1685_v24 }
  0xa3   :  { %1551 = vset.pattern.permute.xlu1 %v1577_v0 }
  0xa4   :  { %807 = vperm.xlu1 %1551, %v1722_v41  }
  0xa5   :  { %1552 = vset.pattern.permute.xlu2 %v1577_v0  ;;  %636 = vmatpush.bf16.msra.mxu0 %v1506_v54 }
  0xa6   :  { %810 = vperm.xlu2 %1552, %v1658_v14   ;;  %1174 = vmatpush.bf16.msra.mxu2 %v1506_v54 }
  0xa7   :  { %v1822_v27 = vpop.permute.xlu1 %261 }
  0xa8   :  { %v1827_v30 = vpop.permute.xlu0 %79  ;;  %1572 = vset.pattern.permute.xlu0 %v1581_v12 }
  0xa9   :  { %v1860_v45 = vpop.permute.xlu2 %352  ;;  %637 = vmatpush.bf16.msra.mxu0 %v1505_v29  ;;  %vm102_vm4 = vcmp.eq.s32.totalorder %v1827_v30, %v1679_v20  ;;  %vm103_vm5 = vcmp.eq.s32.totalorder %v1827_v30, %v1685_v24 }
  0xaa   :  { %1175 = vmatpush.bf16.msra.mxu2 %v1505_v29  ;;  %v1282_v30 = vsel %vm103_vm5, 1.0, %v1582_v25  ;;  %v1347_v29 = vsel %vm456_vm12, 1.0, %v1582_v25  ;;  %vm373_vm5 = vcmp.eq.s32.totalorder %v1860_v45, %v1685_v24 }
  0xab   :  { %v239_v54 = vadd.f32 %v1298_v17, %v1282_v30 }
  0xac   :  { %1553 = vset.pattern.permute.xlu1 %v1579_v10 }
  0xad   :  { %895 = vperm.xlu1 %1553, %v1722_v41  }
  0xae   :  { %1554 = vset.pattern.permute.xlu2 %v1579_v10 }
  0xaf   :  { %v1845_v34 = vpop.permute.xlu1 %267  ;;  %898 = vperm.xlu2 %1554, %v1658_v14  }
  0xb0   :  { %v83_v22 = vpop.permute.xlu0 %82 }
  0xb1   :  { %vm104_vm8 = vcmp.eq.s32.totalorder %v83_v22, %v1679_v20  ;;  %vm105_vm9 = vcmp.eq.s32.totalorder %v83_v22, %v1685_v24  ;;  %v1918_v32 = vpop.permute.xlu2 %358  ;;  %v1281_v22 = vsel %vm102_vm4, 1.0, %v1582_v25  ;;  %vm372_vm4 = vcmp.eq.s32.totalorder %v1860_v45, %v1679_v20 }
  0xb2   :  { %v1283_v49 = vsel %vm104_vm8, 1.0, %v1582_v25  ;;  %v1284_v50 = vsel %vm105_vm9, 1.0, %v1582_v25  ;;  %vm278_vm8 = vcmp.eq.s32.totalorder %v1729_v44, %v1679_v20  ;;  %vm279_vm9 = vcmp.eq.s32.totalorder %v1729_v44, %v1685_v24 }
  0xb3   :  { %v240_v57 = vadd.f32 %v1299_v38, %v1283_v49  ;;  %v241_v58 = vadd.f32 %v1300_v42, %v1284_v50  ;;  %v1319_v42 = vsel %vm284_vm6, 1.0, %v1582_v25  ;;  %v1313_v44 = vsel %vm278_vm8, 1.0, %v1582_v25 }
  0xb4   :  { %v1314_v53 = vsel %vm279_vm9, 1.0, %v1582_v25  ;;  %v332_v56 = vadd.f32 %v1319_v42, %v1704_v35 }
  0xb5   :  { %1555 = vset.pattern.permute.xlu1 %v1581_v12  ;;  %v1888_v59 = vadd.f32 %v1315_v47, %v240_v57  ;;  %v1890_v62 = vadd.f32 %v1316_v48, %v241_v58  ;;  %v1320_v47 = vsel %vm285_vm7, 1.0, %v1582_v25  ;;  %v1323_v57 = vsel %vm288_vm10, 1.0, %v1582_v25 }
  0xb6   :  { %986 = vperm.xlu1 %1555, %v1658_v14   ;;  %v333_v55 = vadd.f32 %v1320_v47, %v1706_v36  ;;  %v1324_v58 = vsel %vm289_vm11, 1.0, %v1582_v25  ;;  %v2019_v46 = vadd.f32 %v1323_v57, %v1714_v39 }
  0xb7   :  { %v277_v4 = vpop.permute.xlu1 %276  ;;  %1556 = vset.pattern.permute.xlu2 %v1580_v11 }
  0xb8   :  { %vm292_vm14 = vcmp.eq.s32.totalorder %v277_v4, %v1679_v20  ;;  %vm293_vm15 = vcmp.eq.s32.totalorder %v277_v4, %v1685_v24  ;;  %v98_v8 = vpop.permute.xlu0 %97  ;;  %1071 = vperm.xlu2 %1556, %v1722_v41  }
  0xb9   :  { %v1327_v9 = vsel %vm292_vm14, 1.0, %v1582_v25  ;;  %v1328_v13 = vsel %vm293_vm15, 1.0, %v1582_v25  ;;  %vm114_vm0 = vcmp.eq.s32.totalorder %v98_v8, %v1679_v20  ;;  %vm115_vm1 = vcmp.eq.s32.totalorder %v98_v8, %v1685_v24 }
  0xba   :  { %v1911_v18 = vadd.f32 %v1327_v9, %v1797_v15  ;;  %v1914_v19 = vadd.f32 %v1328_v13, %v1799_v16  ;;  %v1293_v23 = vsel %vm114_vm0, 1.0, %v1582_v25  ;;  %v1294_v41 = vsel %vm115_vm1, 1.0, %v1582_v25  ;;  %v432_v38 = vpop.permute.xlu2 %431 }
  0xbb   :  { %v250_v26 = vadd.f32 %v1309_v63, %v1293_v23  ;;  %v251_v31 = vadd.f32 %v1310_v3, %v1294_v41  ;;  %vm282_vm14 = vcmp.eq.s32.totalorder %v1822_v27, %v1679_v20  ;;  %vm283_vm15 = vcmp.eq.s32.totalorder %v1822_v27, %v1685_v24 }
  0xbc   :  { %v1348_v63 = vsel %vm457_vm13, 1.0, %v1582_v25  ;;  %vm366_vm0 = vcmp.eq.s32.totalorder %v1825_v28, %v1679_v20  ;;  %vm367_vm1 = vcmp.eq.s32.totalorder %v1825_v28, %v1685_v24  ;;  %v1317_v35 = vsel %vm282_vm14, 1.0, %v1582_v25 }
  0xbd   :  { %v1920_v33 = vadd.f32 %v1325_v5, %v250_v26  ;;  %v1922_v37 = vadd.f32 %v1326_v7, %v251_v31  ;;  %v1318_v36 = vsel %vm283_vm15, 1.0, %v1582_v25  ;;  %v327_v3 = vadd.f32 %v1314_v53, %v239_v54  ;;  %v2065_v53 = vld [vmem:[%s2401_s0 + $0x70] sm:$0xff] }
  0xbe   :  { %1557 = vset.pattern.permute.xlu1 %v1580_v11  ;;  %v1329_v4 = vsel %vm366_vm0, 1.0, %v1582_v25  ;;  %v1330_v27 = vsel %vm367_vm1, 1.0, %v1582_v25  ;;  %vm454_vm6 = vcmp.eq.s32.totalorder %v432_v38, %v1679_v20  ;;  %vm455_vm7 = vcmp.eq.s32.totalorder %v432_v38, %v1685_v24  ;;  %995 = vperm.xlu0 %1572, %v2065_v53  }
  0xbf   :  { %1074 = vperm.xlu1 %1557, %v1658_v14   ;;  %v1297_v14 = vsel %vm190_vm2, 1.0, %v1582_v25  ;;  %vm466_vm2 = vcmp.eq.s32.totalorder %v1791_v6, %v1679_v20  ;;  %v2022_v5 = vadd.f32 %v1324_v58, %v1716_v40  ;;  %v2034_v7 = vsel %vm467_vm3, 1.0, %v1582_v25 }
  0xc0   :  { %v1926_v15 = vpop.permute.xlu1 %349  ;;  %v1928_v16 = vpop.permute.xlu0 %716  ;;  %1558 = vset.pattern.permute.xlu2 %v1578_v1  ;;  %v238_v50 = vadd.f32 %v1297_v14, %v1281_v22  ;;  %v2028_v45 = vsel %vm466_vm2, 1.0, %v1582_v25  ;;  %v330_v8 = vadd.f32 %v1317_v35, %v1743_v51  ;;  %v331_v39 = vadd.f32 %v1318_v36, %v1745_v52 }
  0xc1   :  { %725 = vperm.xlu2 %1558, %v1812_v21   ;;  %v1335_v9 = vsel %vm372_vm4, 1.0, %v1582_v25  ;;  %v1336_v40 = vsel %vm373_vm5, 1.0, %v1582_v25  ;;  %v1345_v41 = vsel %vm454_vm6, 1.0, %v1582_v25  ;;  %v1346_v26 = vsel %vm455_vm7, 1.0, %v1582_v25 }
  0xc2   :  { %v326_v28 = vadd.f32 %v1313_v44, %v238_v50  ;;  %v441_v13 = vpop.permute.xlu2 %440  ;;  %v415_v51 = vadd.f32 %v1330_v27, %v327_v3  ;;  %vm370_vm8 = vcmp.eq.s32.totalorder %v1926_v15, %v1679_v20  ;;  %vm371_vm9 = vcmp.eq.s32.totalorder %v1926_v15, %v1685_v24 }
  0xc3   :  { %vm460_vm12 = vcmp.eq.s32.totalorder %v441_v13, %v1679_v20  ;;  %vm461_vm13 = vcmp.eq.s32.totalorder %v441_v13, %v1685_v24  ;;  %v420_v17 = vadd.f32 %v1335_v9, %v332_v56  ;;  %v421_v22 = vadd.f32 %v1336_v40, %v333_v55 }
  0xc4   :  { %v414_v31 = vadd.f32 %v1329_v4, %v326_v28  ;;  %v1333_v38 = vsel %vm370_vm8, 1.0, %v1582_v25  ;;  %v1334_v42 = vsel %vm371_vm9, 1.0, %v1582_v25  ;;  %v503_v44 = vadd.f32 %v1346_v26, %v415_v51 }
  0xc5   :  { %v1351_v50 = vsel %vm460_vm12, 1.0, %v1582_v25  ;;  %v1352_v54 = vsel %vm461_vm13, 1.0, %v1582_v25  ;;  %vm286_vm14 = vcmp.eq.s32.totalorder %v1845_v34, %v1679_v20  ;;  %vm287_vm15 = vcmp.eq.s32.totalorder %v1845_v34, %v1685_v24 }
  0xc6   :  { %v502_v47 = vadd.f32 %v1345_v41, %v414_v31  ;;  %vm376_vm0 = vcmp.eq.s32.totalorder %v1918_v32, %v1679_v20  ;;  %vm377_vm1 = vcmp.eq.s32.totalorder %v1918_v32, %v1685_v24  ;;  %v419_v55 = vadd.f32 %v1334_v42, %v331_v39  ;;  %1576 = vset.pattern.permute.xlu0 %v1580_v11 }
  0xc7   :  { %1559 = vset.pattern.permute.xlu1 %v1577_v0  ;;  %v2084_v35 = vadd.f32 %v1351_v50, %v420_v17  ;;  %v2086_v36 = vadd.f32 %v1352_v54, %v421_v22  ;;  %v1321_v28 = vsel %vm286_vm14, 1.0, %v1582_v25  ;;  %v1322_v41 = vsel %vm287_vm15, 1.0, %v1582_v25 }
  0xc8   :  { %813 = vperm.xlu1 %1559, %v1812_v21   ;;  %v1966_v48 = vpop.permute.xlu1 %355  ;;  %v1968_v49 = vpop.permute.xlu0 %722 }
  0xc9   :  { %1560 = vset.pattern.permute.xlu2 %v1577_v0  ;;  %vm374_vm2 = vcmp.eq.s32.totalorder %v1966_v48, %v1679_v20  ;;  %vm375_vm3 = vcmp.eq.s32.totalorder %v1966_v48, %v1685_v24 }
  0xca   :  { %816 = vperm.xlu2 %1560, %v1865_v43   ;;  %v447_v3 = vpop.permute.xlu2 %446  ;;  %v1338_v31 = vsel %vm375_vm3, 1.0, %v1582_v25 }
  0xcb   :  { %vm464_vm8 = vcmp.eq.s32.totalorder %v447_v3, %v1679_v20  ;;  %vm465_vm9 = vcmp.eq.s32.totalorder %v447_v3, %v1685_v24 }
  0xcc   :  { %v1355_v17 = vsel %vm464_vm8, 1.0, %v1582_v25  ;;  %v1356_v22 = vsel %vm465_vm9, 1.0, %v1582_v25 }
  0xd0   :  { %1561 = vset.pattern.permute.xlu1 %v1579_v10  ;;  %v2041_v23 = vpop.permute.xlu1 %364 }
  0xd1   :  { %901 = vperm.xlu1 %1561, %v1812_v21   ;;  %v347_v6 = vpop.permute.xlu0 %346  ;;  %vm380_vm12 = vcmp.eq.s32.totalorder %v2041_v23, %v1679_v20  ;;  %vm381_vm13 = vcmp.eq.s32.totalorder %v2041_v23, %v1685_v24 }
  0xd2   :  { %vm368_vm10 = vcmp.eq.s32.totalorder %v347_v6, %v1679_v20  ;;  %vm369_vm11 = vcmp.eq.s32.totalorder %v347_v6, %v1685_v24  ;;  %1562 = vset.pattern.permute.xlu2 %v1579_v10  ;;  %v1343_v54 = vsel %vm380_vm12, 1.0, %v1582_v25 }
  0xd3   :  { %v1331_v52 = vsel %vm368_vm10, 1.0, %v1582_v25  ;;  %v1332_v14 = vsel %vm369_vm11, 1.0, %v1582_v25  ;;  %904 = vperm.xlu2 %1562, %v1865_v43  }
  0xd4   :  { %v416_v15 = vadd.f32 %v1331_v52, %v1888_v59  ;;  %v417_v30 = vadd.f32 %v1332_v14, %v1890_v62  ;;  %v418_v62 = vadd.f32 %v1333_v38, %v330_v8  ;;  %v334_v52 = vadd.f32 %v1321_v28, %v1765_v60  ;;  %v714_v60 = vpop.permute.xlu2 %713 }
  0xd5   :  { %v335_v14 = vadd.f32 %v1322_v41, %v1767_v61 }
  0xd6   :  { %v504_v59 = vadd.f32 %v1347_v29, %v416_v15  ;;  %v505_v56 = vadd.f32 %v1348_v63, %v417_v30 }
  0xd7   :  { %v423_v42 = vadd.f32 %v1338_v31, %v335_v14 }
  0xd8   :  { %v526_v57 = vpack.c.bf16 %v504_v59, %v502_v47  ;;  %v527_v58 = vpack.c.bf16 %v505_v56, %v503_v44  ;;  %v428_v56 = vadd.f32 %v1343_v54, %v1911_v18 }
  0xd9   :  { %1564 = vset.pattern.permute.xlu1 %v1581_v12  ;;  %v438_v29 = vpop.permute.xlu1 %437  ;;  %v362_v63 = vpop.permute.xlu0 %361 }
  0xda   :  { %vm458_vm4 = vcmp.eq.s32.totalorder %v438_v29, %v1679_v20  ;;  %vm459_vm5 = vcmp.eq.s32.totalorder %v438_v29, %v1685_v24  ;;  %992 = vperm.xlu1 %1564, %v1865_v43   ;;  %638 = vmatmul.bf16.vlgmr.msra.gmra.mxu0 %v526_v57  ;;  %vm378_vm6 = vcmp.eq.s32.totalorder %v362_v63, %v1679_v20 }
  0xdb   :  { %v1349_v4 = vsel %vm458_vm4, 1.0, %v1582_v25  ;;  %v1350_v27 = vsel %vm459_vm5, 1.0, %v1582_v25  ;;  %667 = vmatmul.bf16.vlgmr.msra.gmra.mxu1 %v527_v58  ;;  %vm379_vm7 = vcmp.eq.s32.totalorder %v362_v63, %v1685_v24  ;;  %v1341_v8 = vsel %vm378_vm6, 1.0, %v1582_v25  ;;  %1565 = vset.pattern.permute.xlu2 %v1580_v11 }
  0xdc   :  { %v1342_v39 = vsel %vm379_vm7, 1.0, %v1582_v25  ;;  %v426_v9 = vadd.f32 %v1341_v8, %v1920_v33  ;;  %v506_v40 = vadd.f32 %v1349_v4, %v418_v62  ;;  %v507_v13 = vadd.f32 %v1350_v27, %v419_v55  ;;  %1077 = vperm.xlu2 %1565, %v1812_v21   ;;  %v805_v18 = vpop.permute.xlu2 %804 }
  0xdd   :  { %v427_v26 = vadd.f32 %v1342_v39, %v1922_v37  ;;  %v1339_v33 = vsel %vm376_vm0, 1.0, %v1582_v25  ;;  %v1340_v21 = vsel %vm377_vm1, 1.0, %v1582_v25  ;;  %v1337_v37 = vsel %vm374_vm2, 1.0, %v1582_v25 }
  0xde   :  { %v528_v6 = vpack.c.bf16 %v2084_v35, %v506_v40  ;;  %v529_v34 = vpack.c.bf16 %v2086_v36, %v507_v13  ;;  %v2128_v51 = vadd.f32 %v2028_v45, %v426_v9  ;;  %v424_v15 = vadd.f32 %v1339_v33, %v2019_v46 }
  0xdf   :  { %v2131_v32 = vadd.f32 %v2034_v7, %v427_v26  ;;  %v425_v30 = vadd.f32 %v1340_v21, %v2022_v5  ;;  %v422_v38 = vadd.f32 %v1337_v37, %v334_v52  ;;  %vm736_vm0 = vcmp.eq.s32.totalorder %v714_v60, %v1679_v20 }
  0xe0   :  { %v512_v7 = vadd.f32 %v1355_v17, %v424_v15  ;;  %vm737_vm1 = vcmp.eq.s32.totalorder %v714_v60, %v1685_v24  ;;  %vm738_vm4 = vcmp.eq.s32.totalorder %v1928_v16, %v1679_v20  ;;  %vm739_vm5 = vcmp.eq.s32.totalorder %v1928_v16, %v1685_v24 }
  0xe1   :  { %v444_v48 = vpop.permute.xlu1 %443  ;;  %v513_v46 = vadd.f32 %v1356_v22, %v425_v30  ;;  %vm826_vm6 = vcmp.eq.s32.totalorder %v805_v18, %v1679_v20  ;;  %vm827_vm7 = vcmp.eq.s32.totalorder %v805_v18, %v1685_v24  ;;  %v1425_v35 = vsel %vm736_vm0, 1.0, %v1582_v25 }
  0xe2   :  { %vm462_vm10 = vcmp.eq.s32.totalorder %v444_v48, %v1679_v20  ;;  %vm463_vm11 = vcmp.eq.s32.totalorder %v444_v48, %v1685_v24  ;;  %1566 = vset.pattern.permute.xlu1 %v1580_v11  ;;  %v1427_v16 = vsel %vm738_vm4, 1.0, %v1582_v25  ;;  %v1428_v3 = vsel %vm739_vm5, 1.0, %v1582_v25 }
  0xe3   :  { %v1353_v61 = vsel %vm462_vm10, 1.0, %v1582_v25  ;;  %v1354_v45 = vsel %vm463_vm11, 1.0, %v1582_v25  ;;  %1080 = vperm.xlu1 %1566, %v1865_v43   ;;  %v1344_v43 = vsel %vm381_vm13, 1.0, %v1582_v25  ;;  %v1443_v4 = vsel %vm826_vm6, 1.0, %v1582_v25 }
  0xe4   :  { %1567 = vset.pattern.permute.xlu2 %v1578_v1  ;;  %v510_v5 = vadd.f32 %v1353_v61, %v422_v38  ;;  %v511_v47 = vadd.f32 %v1354_v45, %v423_v42  ;;  %v429_v62 = vadd.f32 %v1344_v43, %v1914_v19  ;;  %v1444_v27 = vsel %vm827_vm7, 1.0, %v1582_v25 }
  0xe5   :  { %731 = vperm.xlu2 %1567, %v2065_v53   ;;  %v893_v63 = vpop.permute.xlu2 %892  ;;  %v874_v41 = vadd.f32 %v1443_v4, %v1427_v16  ;;  %v875_v26 = vadd.f32 %v1444_v27, %v1428_v3 }
  0xe6   :  { %v530_v44 = vpack.c.bf16 %v512_v7, %v510_v5  ;;  %v531_v50 = vpack.c.bf16 %v513_v46, %v511_v47  ;;  %vm914_vm12 = vcmp.eq.s32.totalorder %v893_v63, %v1679_v20  ;;  %vm915_vm13 = vcmp.eq.s32.totalorder %v893_v63, %v1685_v24 }
  0xe9   :  { %v453_v59 = vpop.permute.xlu1 %452 }
  0xea   :  { %vm468_vm14 = vcmp.eq.s32.totalorder %v453_v59, %v1679_v20  ;;  %vm469_vm15 = vcmp.eq.s32.totalorder %v453_v59, %v1685_v24  ;;  %643 = vmatmul.bf16.gmra.mxu0 %v528_v6  ;;  %v1459_v6 = vsel %vm914_vm12, 1.0, %v1582_v25 }
  0xeb   :  { %v1359_v1 = vsel %vm468_vm14, 1.0, %v1582_v25  ;;  %v1360_v23 = vsel %vm469_vm15, 1.0, %v1582_v25  ;;  %672 = vmatmul.bf16.gmra.mxu1 %v529_v34  ;;  %1568 = vset.pattern.permute.xlu1 %v1577_v0  ;;  %v1460_v34 = vsel %vm915_vm13, 1.0, %v1582_v25 }
  0xec   :  { %819 = vperm.xlu1 %1568, %v2065_v53   ;;  %v2161_v55 = vadd.f32 %v1359_v1, %v428_v56  ;;  %v2163_v57 = vadd.f32 %v1360_v23, %v429_v62  ;;  %v963_v52 = vadd.f32 %v1460_v34, %v875_v26 }
  0xed   :  { %1569 = vset.pattern.permute.xlu2 %v1577_v0 }
  0xee   :  { %822 = vperm.xlu2 %1569, %v2007_v2   ;;  %v532_v19 = vpack.c.bf16 %v2161_v55, %v2128_v51  ;;  %v533_v58 = vpack.c.bf16 %v2163_v57, %v2131_v32  ;;  %v962_v32 = vadd.f32 %v1459_v6, %v874_v41 }
  0xf2   :  { %v802_v29 = vpop.permute.xlu1 %801 }
  0xf3   :  { %vm824_vm2 = vcmp.eq.s32.totalorder %v802_v29, %v1679_v20  ;;  %vm825_vm3 = vcmp.eq.s32.totalorder %v802_v29, %v1685_v24 }
  0xf4   :  { %1570 = vset.pattern.permute.xlu1 %v1579_v10  ;;  %v1441_v36 = vsel %vm824_vm2, 1.0, %v1582_v25  ;;  %v1442_v28 = vsel %vm825_vm3, 1.0, %v1582_v25 }
  0xf5   :  { %907 = vperm.xlu1 %1570, %v2065_v53   ;;  %v872_v40 = vadd.f32 %v1441_v36, %v1425_v35 }
  0xf6   :  { %1571 = vset.pattern.permute.xlu2 %v1579_v10  ;;  %v1066_v10 = vpop.permute.xlu2 %1065 }
  0xf7   :  { %910 = vperm.xlu2 %1571, %v2007_v2   ;;  %vm1088_vm0 = vcmp.eq.s32.totalorder %v1066_v10, %v1679_v20 }
  0xf8   :  { %v1489_v22 = vsel %vm1088_vm0, 1.0, %v1582_v25 }
  0xfa   :  { %648 = vmatmul.bf16.gmra.mxu0 %v530_v44 }
  0xfb   :  { %677 = vmatmul.bf16.gmra.mxu1 %v531_v50  ;;  %v890_v0 = vpop.permute.xlu1 %889 }
  0xfc   :  { %vm912_vm8 = vcmp.eq.s32.totalorder %v890_v0, %v1679_v20  ;;  %vm913_vm9 = vcmp.eq.s32.totalorder %v890_v0, %v1685_v24 }
  0xfd   :  { %1573 = vset.pattern.permute.xlu1 %v1581_v12  ;;  %v978_v12 = vpop.permute.xlu0 %977  ;;  %v1457_v39 = vsel %vm912_vm8, 1.0, %v1582_v25  ;;  %v1458_v9 = vsel %vm913_vm9, 1.0, %v1582_v25  ;;  %vm742_vm8 = vcmp.eq.s32.totalorder %v1968_v49, %v1679_v20  ;;  %vm743_vm9 = vcmp.eq.s32.totalorder %v1968_v49, %v1685_v24 }
  0xfe   :  { %998 = vperm.xlu1 %1573, %v2007_v2   ;;  %vm1000_vm10 = vcmp.eq.s32.totalorder %v978_v12, %v1679_v20  ;;  %vm1001_vm11 = vcmp.eq.s32.totalorder %v978_v12, %v1685_v24  ;;  %v960_v33 = vadd.f32 %v1457_v39, %v872_v40  ;;  %v1431_v49 = vsel %vm742_vm8, 1.0, %v1582_v25 }
  0xff   :  { %1574 = vset.pattern.permute.xlu2 %v1580_v11  ;;  %v1473_v37 = vsel %vm1000_vm10, 1.0, %v1582_v25  ;;  %v1432_v57 = vsel %vm743_vm9, 1.0, %v1582_v25 }
 0x100   :  { %1083 = vperm.xlu2 %1574, %v2065_v53   ;;  %v1426_v53 = vsel %vm737_vm1, 1.0, %v1582_v25  ;;  %vm1089_vm1 = vcmp.eq.s32.totalorder %v1066_v10, %v1685_v24  ;;  %v1048_v14 = vadd.f32 %v1473_v37, %v960_v33 }
 0x101   :  { %v873_v13 = vadd.f32 %v1442_v28, %v1426_v53  ;;  %v1490_v15 = vsel %vm1089_vm1, 1.0, %v1582_v25 }
 0x102   :  { %v1136_v61 = vadd.f32 %v1489_v22, %v1048_v14 }
 0x103   :  { %v961_v21 = vadd.f32 %v1458_v9, %v873_v13 }
 0x104   :  { %v981_v8 = vpop.permute.xlu1 %980 }
 0x105   :  { %vm1002_vm14 = vcmp.eq.s32.totalorder %v981_v8, %v1679_v20  ;;  %vm1003_vm15 = vcmp.eq.s32.totalorder %v981_v8, %v1685_v24  ;;  %v984_v59 = vpop.permute.xlu0 %983 }
 0x106   :  { %1575 = vset.pattern.permute.xlu1 %v1580_v11  ;;  %v1474_v11 = vsel %vm1001_vm11, 1.0, %v1582_v25  ;;  %v1475_v31 = vsel %vm1002_vm14, 1.0, %v1582_v25  ;;  %v1476_v51 = vsel %vm1003_vm15, 1.0, %v1582_v25  ;;  %vm1004_vm14 = vcmp.eq.s32.totalorder %v984_v59, %v1679_v20 }
 0x107   :  { %1086 = vperm.xlu1 %1575, %v2007_v2   ;;  %v720_v2 = vpop.permute.xlu2 %719  ;;  %v1049_v17 = vadd.f32 %v1474_v11, %v961_v21  ;;  %v1050_v48 = vadd.f32 %v1475_v31, %v962_v32  ;;  %v1051_v38 = vadd.f32 %v1476_v51, %v963_v52  ;;  %vm1005_vm15 = vcmp.eq.s32.totalorder %v984_v59, %v1685_v24 }
 0x108   :  { %vm740_vm4 = vcmp.eq.s32.totalorder %v720_v2, %v1679_v20  ;;  %vm741_vm5 = vcmp.eq.s32.totalorder %v720_v2, %v1685_v24  ;;  %v1477_v3 = vsel %vm1004_vm14, 1.0, %v1582_v25  ;;  %v1478_v4 = vsel %vm1005_vm15, 1.0, %v1582_v25 }
 0x109   :  { %v1137_v7 = vadd.f32 %v1490_v15, %v1049_v17  ;;  %v1429_v56 = vsel %vm740_vm4, 1.0, %v1582_v25  ;;  %v1430_v62 = vsel %vm741_vm5, 1.0, %v1582_v25 }
 0x10a   :  { %653 = vmatmul.bf16.gmra.mxu0 %v532_v19 }
 0x10b   :  { %682 = vmatmul.bf16.gmra.mxu1 %v533_v58 }
 0x10d   :  { %v1069_v30 = vpop.permute.xlu1 %1068  ;;  %v990_v15 = vpop.permute.xlu0 %989 }
 0x10e   :  { %vm1090_vm2 = vcmp.eq.s32.totalorder %v1069_v30, %v1679_v20  ;;  %vm1091_vm3 = vcmp.eq.s32.totalorder %v1069_v30, %v1685_v24 }
 0x10f   :  { %v1491_v42 = vsel %vm1090_vm2, 1.0, %v1582_v25  ;;  %v1492_v60 = vsel %vm1091_vm3, 1.0, %v1582_v25  ;;  %v811_v44 = vpop.permute.xlu2 %810 }
 0x110   :  { %v1138_v45 = vadd.f32 %v1491_v42, %v1050_v48  ;;  %v1139_v46 = vadd.f32 %v1492_v60, %v1051_v38  ;;  %vm830_vm10 = vcmp.eq.s32.totalorder %v811_v44, %v1679_v20  ;;  %vm831_vm11 = vcmp.eq.s32.totalorder %v811_v44, %v1685_v24 }
 0x111   :  { %v1447_v18 = vsel %vm830_vm10, 1.0, %v1582_v25  ;;  %v1448_v19 = vsel %vm831_vm11, 1.0, %v1582_v25 }
 0x112   :  { %v1160_v5 = vpack.c.bf16 %v1138_v45, %v1136_v61  ;;  %v1161_v47 = vpack.c.bf16 %v1139_v46, %v1137_v7  ;;  %v878_v12 = vadd.f32 %v1447_v18, %v1431_v49  ;;  %v879_v35 = vadd.f32 %v1448_v19, %v1432_v57 }
 0x114   :  { %1176 = vmatmul.bf16.vlgmr.msra.gmra.mxu2 %v1160_v5  ;;  %1205 = vmatmul.bf16.vlgmr.msra.gmra.mxu3 %v1161_v47 }
 0x115   :  { %v729_v38 = vpop.permute.xlu0 %728 }
 0x116   :  { %v808_v50 = vpop.permute.xlu1 %807  ;;  %vm746_vm14 = vcmp.eq.s32.totalorder %v729_v38, %v1679_v20  ;;  %vm747_vm15 = vcmp.eq.s32.totalorder %v729_v38, %v1685_v24 }
 0x117   :  { %v899_v54 = vpop.permute.xlu2 %898  ;;  %vm828_vm6 = vcmp.eq.s32.totalorder %v808_v50, %v1679_v20  ;;  %vm829_vm7 = vcmp.eq.s32.totalorder %v808_v50, %v1685_v24  ;;  %v1435_v5 = vsel %vm746_vm14, 1.0, %v1582_v25  ;;  %v1436_v47 = vsel %vm747_vm15, 1.0, %v1582_v25 }
 0x118   :  { %v1445_v1 = vsel %vm828_vm6, 1.0, %v1582_v25  ;;  %v1446_v23 = vsel %vm829_vm7, 1.0, %v1582_v25  ;;  %vm918_vm0 = vcmp.eq.s32.totalorder %v899_v54, %v1679_v20  ;;  %vm919_vm1 = vcmp.eq.s32.totalorder %v899_v54, %v1685_v24 }
 0x119   :  { %v876_v0 = vadd.f32 %v1445_v1, %v1429_v56  ;;  %v877_v10 = vadd.f32 %v1446_v23, %v1430_v62  ;;  %v1463_v28 = vsel %vm918_vm0, 1.0, %v1582_v25  ;;  %v1464_v16 = vsel %vm919_vm1, 1.0, %v1582_v25 }
 0x11a   :  { %v966_v9 = vadd.f32 %v1463_v28, %v878_v12  ;;  %v967_v40 = vadd.f32 %v1464_v16, %v879_v35 }
 0x11f   :  { %v896_v43 = vpop.permute.xlu1 %895  ;;  %v1072_v55 = vpop.permute.xlu2 %1071 }
 0x120   :  { %vm916_vm12 = vcmp.eq.s32.totalorder %v896_v43, %v1679_v20  ;;  %vm917_vm13 = vcmp.eq.s32.totalorder %v896_v43, %v1685_v24  ;;  %vm1092_vm4 = vcmp.eq.s32.totalorder %v1072_v55, %v1679_v20  ;;  %vm1093_vm5 = vcmp.eq.s32.totalorder %v1072_v55, %v1685_v24 }
 0x121   :  { %v1461_v29 = vsel %vm916_vm12, 1.0, %v1582_v25  ;;  %v1462_v63 = vsel %vm917_vm13, 1.0, %v1582_v25  ;;  %v1493_v26 = vsel %vm1092_vm4, 1.0, %v1582_v25  ;;  %v1494_v33 = vsel %vm1093_vm5, 1.0, %v1582_v25 }
 0x122   :  { %v964_v53 = vadd.f32 %v1461_v29, %v876_v0  ;;  %v965_v36 = vadd.f32 %v1462_v63, %v877_v10  ;;  %vm1008_vm4 = vcmp.eq.s32.totalorder %v990_v15, %v1679_v20  ;;  %vm1009_vm5 = vcmp.eq.s32.totalorder %v990_v15, %v1685_v24 }
 0x123   :  { %v1481_v18 = vsel %vm1008_vm4, 1.0, %v1582_v25  ;;  %v1482_v19 = vsel %vm1009_vm5, 1.0, %v1582_v25 }
 0x124   :  { %v1052_v13 = vadd.f32 %v1477_v3, %v964_v53  ;;  %v1053_v41 = vadd.f32 %v1478_v4, %v965_v36 }
 0x126   :  { %v1140_v2 = vadd.f32 %v1493_v26, %v1052_v13  ;;  %v1141_v51 = vadd.f32 %v1494_v33, %v1053_v41 }
 0x127   :  { %v726_v39 = vpop.permute.xlu2 %725 }
 0x128   :  { %v987_v58 = vpop.permute.xlu1 %986  ;;  %vm744_vm8 = vcmp.eq.s32.totalorder %v726_v39, %v1679_v20  ;;  %vm745_vm9 = vcmp.eq.s32.totalorder %v726_v39, %v1685_v24 }
 0x129   :  { %vm1006_vm2 = vcmp.eq.s32.totalorder %v987_v58, %v1679_v20  ;;  %vm1007_vm3 = vcmp.eq.s32.totalorder %v987_v58, %v1685_v24  ;;  %v1433_v42 = vsel %vm744_vm8, 1.0, %v1582_v25  ;;  %v1434_v60 = vsel %vm745_vm9, 1.0, %v1582_v25 }
 0x12a   :  { %v1479_v27 = vsel %vm1006_vm2, 1.0, %v1582_v25  ;;  %v1480_v8 = vsel %vm1007_vm3, 1.0, %v1582_v25 }
 0x12b   :  { %v1054_v6 = vadd.f32 %v1479_v27, %v966_v9  ;;  %v1055_v34 = vadd.f32 %v1480_v8, %v967_v40 }
 0x12f   :  { %v817_v17 = vpop.permute.xlu2 %816 }
 0x130   :  { %vm834_vm12 = vcmp.eq.s32.totalorder %v817_v17, %v1679_v20  ;;  %vm835_vm13 = vcmp.eq.s32.totalorder %v817_v17, %v1685_v24 }
 0x131   :  { %v1075_v21 = vpop.permute.xlu1 %1074  ;;  %v1451_v7 = vsel %vm834_vm12, 1.0, %v1582_v25  ;;  %v1452_v46 = vsel %vm835_vm13, 1.0, %v1582_v25 }
 0x132   :  { %vm1094_vm6 = vcmp.eq.s32.totalorder %v1075_v21, %v1679_v20  ;;  %vm1095_vm7 = vcmp.eq.s32.totalorder %v1075_v21, %v1685_v24  ;;  %v882_v62 = vadd.f32 %v1451_v7, %v1435_v5  ;;  %v883_v1 = vadd.f32 %v1452_v46, %v1436_v47 }
 0x133   :  { %v1495_v37 = vsel %vm1094_vm6, 1.0, %v1582_v25  ;;  %v1496_v11 = vsel %vm1095_vm7, 1.0, %v1582_v25 }
 0x134   :  { %v1142_v31 = vadd.f32 %v1495_v37, %v1054_v6  ;;  %v1143_v32 = vadd.f32 %v1496_v11, %v1055_v34 }
 0x136   :  { %v1162_v52 = vpack.c.bf16 %v1142_v31, %v1140_v2  ;;  %v1163_v14 = vpack.c.bf16 %v1143_v32, %v1141_v51  ;;  %v735_v31 = vpop.permute.xlu0 %734 }
 0x137   :  { %v905_v30 = vpop.permute.xlu2 %904 }
 0x138   :  { %1181 = vmatmul.bf16.gmra.mxu2 %v1162_v52  ;;  %1210 = vmatmul.bf16.gmra.mxu3 %v1163_v14  ;;  %vm922_vm2 = vcmp.eq.s32.totalorder %v905_v30, %v1679_v20  ;;  %vm923_vm3 = vcmp.eq.s32.totalorder %v905_v30, %v1685_v24 }
 0x139   :  { %v1467_v49 = vsel %vm922_vm2, 1.0, %v1582_v25  ;;  %v1468_v57 = vsel %vm923_vm3, 1.0, %v1582_v25  ;;  %vm751_vm3 = vcmp.eq.s32.totalorder %v735_v31, %v1685_v24 }
 0x13a   :  { %v814_v22 = vpop.permute.xlu1 %813  ;;  %v970_v63 = vadd.f32 %v1467_v49, %v882_v62  ;;  %v971_v0 = vadd.f32 %v1468_v57, %v883_v1  ;;  %v1440_v7 = vsel %vm751_vm3, 1.0, %v1582_v25 }
 0x13b   :  { %vm832_vm10 = vcmp.eq.s32.totalorder %v814_v22, %v1679_v20  ;;  %vm833_vm11 = vcmp.eq.s32.totalorder %v814_v22, %v1685_v24 }
 0x13c   :  { %v1449_v61 = vsel %vm832_vm10, 1.0, %v1582_v25  ;;  %v1450_v45 = vsel %vm833_vm11, 1.0, %v1582_v25 }
 0x13d   :  { %v880_v59 = vadd.f32 %v1449_v61, %v1433_v42  ;;  %v881_v56 = vadd.f32 %v1450_v45, %v1434_v60 }
 0x13e   :  { %v996_v22 = vpop.permute.xlu0 %995 }
 0x13f   :  { %v1078_v43 = vpop.permute.xlu2 %1077 }
 0x140   :  { %vm1096_vm8 = vcmp.eq.s32.totalorder %v1078_v43, %v1679_v20  ;;  %vm1097_vm9 = vcmp.eq.s32.totalorder %v1078_v43, %v1685_v24 }
 0x141   :  { %v1497_v35 = vsel %vm1096_vm8, 1.0, %v1582_v25  ;;  %v1498_v53 = vsel %vm1097_vm9, 1.0, %v1582_v25 }
 0x143   :  { %v902_v48 = vpop.permute.xlu1 %901 }
 0x144   :  { %vm920_vm0 = vcmp.eq.s32.totalorder %v902_v48, %v1679_v20  ;;  %vm921_vm1 = vcmp.eq.s32.totalorder %v902_v48, %v1685_v24 }
 0x145   :  { %v1465_v50 = vsel %vm920_vm0, 1.0, %v1582_v25  ;;  %v1466_v54 = vsel %vm921_vm1, 1.0, %v1582_v25  ;;  %vm750_vm0 = vcmp.eq.s32.totalorder %v735_v31, %v1679_v20 }
 0x146   :  { %v968_v23 = vadd.f32 %v1465_v50, %v880_v59  ;;  %v969_v55 = vadd.f32 %v1466_v54, %v881_v56  ;;  %v1439_v42 = vsel %vm750_vm0, 1.0, %v1582_v25 }
 0x147   :  { %v732_v36 = vpop.permute.xlu2 %731 }
 0x148   :  { %v1056_v10 = vadd.f32 %v1481_v18, %v968_v23  ;;  %v1057_v12 = vadd.f32 %v1482_v19, %v969_v55  ;;  %vm748_vm12 = vcmp.eq.s32.totalorder %v732_v36, %v1679_v20  ;;  %vm749_vm13 = vcmp.eq.s32.totalorder %v732_v36, %v1685_v24 }
 0x149   :  { %v1437_v15 = vsel %vm748_vm12, 1.0, %v1582_v25  ;;  %v1438_v30 = vsel %vm749_vm13, 1.0, %v1582_v25 }
 0x14a   :  { %v1144_v9 = vadd.f32 %v1497_v35, %v1056_v10  ;;  %v1145_v13 = vadd.f32 %v1498_v53, %v1057_v12 }
 0x14c   :  { %v993_v44 = vpop.permute.xlu1 %992 }
 0x14d   :  { %vm1010_vm6 = vcmp.eq.s32.totalorder %v993_v44, %v1679_v20  ;;  %vm1011_vm7 = vcmp.eq.s32.totalorder %v993_v44, %v1685_v24 }
 0x14e   :  { %v1483_v58 = vsel %vm1010_vm6, 1.0, %v1582_v25  ;;  %v1484_v29 = vsel %vm1011_vm7, 1.0, %v1582_v25  ;;  %vm1012_vm6 = vcmp.eq.s32.totalorder %v996_v22, %v1679_v20  ;;  %vm1013_vm7 = vcmp.eq.s32.totalorder %v996_v22, %v1685_v24 }
 0x14f   :  { %v1058_v16 = vadd.f32 %v1483_v58, %v970_v63  ;;  %v1059_v3 = vadd.f32 %v1484_v29, %v971_v0  ;;  %v823_v34 = vpop.permute.xlu2 %822  ;;  %v1485_v57 = vsel %vm1012_vm6, 1.0, %v1582_v25  ;;  %v1486_v18 = vsel %vm1013_vm7, 1.0, %v1582_v25 }
 0x150   :  { %vm838_vm1 = vcmp.eq.s32.totalorder %v823_v34, %v1679_v20  ;;  %vm839_vm2 = vcmp.eq.s32.totalorder %v823_v34, %v1685_v24 }
 0x151   :  { %v1455_v61 = vsel %vm838_vm1, 1.0, %v1582_v25  ;;  %v1456_v45 = vsel %vm839_vm2, 1.0, %v1582_v25 }
 0x152   :  { %v886_v59 = vadd.f32 %v1455_v61, %v1439_v42  ;;  %v887_v56 = vadd.f32 %v1456_v45, %v1440_v7 }
 0x155   :  { %v1081_v28 = vpop.permute.xlu1 %1080 }
 0x156   :  { %vm1098_vm10 = vcmp.eq.s32.totalorder %v1081_v28, %v1679_v20  ;;  %vm1099_vm11 = vcmp.eq.s32.totalorder %v1081_v28, %v1685_v24 }
 0x157   :  { %v1499_v4 = vsel %vm1098_vm10, 1.0, %v1582_v25  ;;  %v1500_v27 = vsel %vm1099_vm11, 1.0, %v1582_v25  ;;  %v639_v8 = vpop.f32.mrf.mxu0  ;;  %v911_v14 = vpop.permute.xlu2 %910 }
 0x158   :  { %v668_v39 = vpop.f32.mrf.mxu1  ;;  %v1146_v40 = vadd.f32 %v1499_v4, %v1058_v16  ;;  %v1147_v41 = vadd.f32 %v1500_v27, %v1059_v3  ;;  %vm926_vm8 = vcmp.eq.s32.totalorder %v911_v14, %v1679_v20  ;;  %vm927_vm9 = vcmp.eq.s32.totalorder %v911_v14, %v1685_v24 }
 0x159   :  { %v669_v26 = vadd.f32 %v668_v39, %v639_v8  ;;  %v1471_v55 = vsel %vm926_vm8, 1.0, %v1582_v25  ;;  %v1472_v49 = vsel %vm927_vm9, 1.0, %v1582_v25 }
 0x15a   :  { %v1164_v33 = vpack.c.bf16 %v1146_v40, %v1144_v9  ;;  %v1165_v21 = vpack.c.bf16 %v1147_v41, %v1145_v13  ;;  %v974_v63 = vadd.f32 %v1471_v55, %v886_v59  ;;  %v975_v0 = vadd.f32 %v1472_v49, %v887_v56 }
 0x15b   :  { %1261 = vst [vmem:[%s2403_s2] sm:$0xff] %v669_v26 }
 0x15c   :  { %1186 = vmatmul.bf16.gmra.mxu2 %v1164_v33  ;;  %1215 = vmatmul.bf16.gmra.mxu3 %v1165_v21 }
 0x15e   :  { %v820_v6 = vpop.permute.xlu1 %819 }
 0x15f   :  { %v641_v37 = vpop.f32.mrf.mxu0  ;;  %vm836_vm14 = vcmp.eq.s32.totalorder %v820_v6, %v1679_v20  ;;  %vm837_vm15 = vcmp.eq.s32.totalorder %v820_v6, %v1685_v24  ;;  %v1084_v62 = vpop.permute.xlu2 %1083 }
 0x160   :  { %v670_v11 = vpop.f32.mrf.mxu1  ;;  %v1453_v48 = vsel %vm836_vm14, 1.0, %v1582_v25  ;;  %v1454_v38 = vsel %vm837_vm15, 1.0, %v1582_v25  ;;  %vm1100_vm12 = vcmp.eq.s32.totalorder %v1084_v62, %v1679_v20  ;;  %vm1101_vm13 = vcmp.eq.s32.totalorder %v1084_v62, %v1685_v24 }
 0x161   :  { %v671_v2 = vadd.f32 %v670_v11, %v641_v37  ;;  %v884_v54 = vadd.f32 %v1453_v48, %v1437_v15  ;;  %v885_v43 = vadd.f32 %v1454_v38, %v1438_v30  ;;  %v1501_v53 = vsel %vm1100_vm12, 1.0, %v1582_v25 }
 0x162   :  { %v1502_v36 = vsel %vm1101_vm13, 1.0, %v1582_v25 }
 0x163   :  { %1262 = vst [vmem:[%s2403_s2 + $0x8] sm:$0xff] %v671_v2 }
 0x167   :  { %v908_v51 = vpop.permute.xlu1 %907  ;;  %v644_v32 = vpop.f32.mrf.mxu0 }
 0x168   :  { %v673_v52 = vpop.f32.mrf.mxu1  ;;  %vm924_vm4 = vcmp.eq.s32.totalorder %v908_v51, %v1679_v20  ;;  %vm925_vm5 = vcmp.eq.s32.totalorder %v908_v51, %v1685_v24 }
 0x169   :  { %v674_v17 = vadd.f32 %v673_v52, %v644_v32  ;;  %v1469_v47 = vsel %vm924_vm4, 1.0, %v1582_v25  ;;  %v1470_v44 = vsel %vm925_vm5, 1.0, %v1582_v25 }
 0x16a   :  { %v972_v1 = vadd.f32 %v1469_v47, %v884_v54  ;;  %v973_v23 = vadd.f32 %v1470_v44, %v885_v43 }
 0x16b   :  { %1263 = vst [vmem:[%s2403_s2 + $0x10] sm:$0xff] %v674_v17 }
 0x16c   :  { %v1060_v10 = vadd.f32 %v1485_v57, %v972_v1  ;;  %v1061_v12 = vadd.f32 %v1486_v18, %v973_v23 }
 0x16e   :  { %v1148_v39 = vadd.f32 %v1501_v53, %v1060_v10  ;;  %v1149_v9 = vadd.f32 %v1502_v36, %v1061_v12 }
 0x16f   :  { %v646_v60 = vpop.f32.mrf.mxu0 }
 0x170   :  { %v675_v46 = vpop.f32.mrf.mxu1  ;;  %v999_v5 = vpop.permute.xlu1 %998 }
 0x171   :  { %v676_v50 = vadd.f32 %v675_v46, %v646_v60  ;;  %vm1014_vm10 = vcmp.eq.s32.totalorder %v999_v5, %v1679_v20  ;;  %vm1015_vm11 = vcmp.eq.s32.totalorder %v999_v5, %v1685_v24 }
 0x172   :  { %v1487_v19 = vsel %vm1014_vm10, 1.0, %v1582_v25  ;;  %v1488_v58 = vsel %vm1015_vm11, 1.0, %v1582_v25 }
 0x173   :  { %1264 = vst [vmem:[%s2403_s2 + $0x18] sm:$0xff] %v676_v50  ;;  %v1062_v3 = vadd.f32 %v1487_v19, %v974_v63  ;;  %v1063_v4 = vadd.f32 %v1488_v58, %v975_v0 }
 0x177   :  { %v649_v29 = vpop.f32.mrf.mxu0 }
 0x178   :  { %v678_v35 = vpop.f32.mrf.mxu1 }
 0x179   :  { %v679_v28 = vadd.f32 %v678_v35, %v649_v29  ;;  %v1087_v16 = vpop.permute.xlu1 %1086 }
 0x17a   :  { %vm1102_vm14 = vcmp.eq.s32.totalorder %v1087_v16, %v1679_v20  ;;  %vm1103_vm15 = vcmp.eq.s32.totalorder %v1087_v16, %v1685_v24 }
 0x17b   :  { %1265 = vst [vmem:[%s2403_s2 + $0x20] sm:$0xff] %v679_v28  ;;  %v1503_v27 = vsel %vm1102_vm14, 1.0, %v1582_v25  ;;  %v1504_v8 = vsel %vm1103_vm15, 1.0, %v1582_v25 }
 0x17c   :  { %v1150_v40 = vadd.f32 %v1503_v27, %v1062_v3  ;;  %v1151_v13 = vadd.f32 %v1504_v8, %v1063_v4 }
 0x17e   :  { %v1166_v41 = vpack.c.bf16 %v1150_v40, %v1148_v39  ;;  %v1167_v26 = vpack.c.bf16 %v1151_v13, %v1149_v9 }
 0x17f   :  { %v651_v33 = vpop.f32.mrf.mxu0 }
 0x180   :  { %v680_v21 = vpop.f32.mrf.mxu1  ;;  %1191 = vmatmul.bf16.gmra.mxu2 %v1166_v41  ;;  %1220 = vmatmul.bf16.gmra.mxu3 %v1167_v26 }
 0x181   :  { %v681_v20 = vadd.f32 %v680_v21, %v651_v33 }
 0x183   :  { %1266 = vst [vmem:[%s2403_s2 + $0x28] sm:$0xff] %v681_v20 }
 0x187   :  { %v654_v24 = vpop.f32.mrf.mxu0 }
 0x188   :  { %v683_v6 = vpop.f32.mrf.mxu1 }
 0x189   :  { %v684_v34 = vadd.f32 %v683_v6, %v654_v24 }
 0x18b   :  { %1267 = vst [vmem:[%s2403_s2 + $0x30] sm:$0xff] %v684_v34 }
 0x18f   :  { %v656_v25 = vpop.f32.mrf.mxu0 }
 0x190   :  { %v685_v37 = vpop.f32.mrf.mxu1 }
 0x191   :  { %v686_v11 = vadd.f32 %v685_v37, %v656_v25 }
 0x193   :  { %1268 = vst [vmem:[%s2403_s2 + $0x38] sm:$0xff] %v686_v11 }
 0x197   :  { %v1177_v2 = vpop.f32.mrf.mxu2  ;;  %v1206_v31 = vpop.f32.mrf.mxu3 }
 0x198   :  { %v1207_v51 = vadd.f32 %v1206_v31, %v1177_v2 }
 0x19a   :  { %1269 = vst [vmem:[%s2403_s2 + $0x40] sm:$0xff] %v1207_v51 }
 0x19f   :  { %v1179_v32 = vpop.f32.mrf.mxu2  ;;  %v1208_v52 = vpop.f32.mrf.mxu3 }
 0x1a0   :  { %v1209_v14 = vadd.f32 %v1208_v52, %v1179_v32 }
 0x1a2   :  { %1270 = vst [vmem:[%s2403_s2 + $0x48] sm:$0xff] %v1209_v14 }
 0x1bb   :  { %v1182_v17 = vpop.f32.mrf.mxu2  ;;  %v1211_v22 = vpop.f32.mrf.mxu3 }
 0x1bc   :  { %v1212_v15 = vadd.f32 %v1211_v22, %v1182_v17 }
 0x1be   :  { %1271 = vst [vmem:[%s2403_s2 + $0x50] sm:$0xff] %v1212_v15 }
 0x1c3   :  { %v1184_v30 = vpop.f32.mrf.mxu2  ;;  %v1213_v48 = vpop.f32.mrf.mxu3 }
 0x1c4   :  { %v1214_v38 = vadd.f32 %v1213_v48, %v1184_v30 }
 0x1c6   :  { %1272 = vst [vmem:[%s2403_s2 + $0x58] sm:$0xff] %v1214_v38 }
 0x1df   :  { %v1187_v42 = vpop.f32.mrf.mxu2  ;;  %v1216_v60 = vpop.f32.mrf.mxu3 }
 0x1e0   :  { %v1217_v61 = vadd.f32 %v1216_v60, %v1187_v42 }
 0x1e2   :  { %1273 = vst [vmem:[%s2403_s2 + $0x60] sm:$0xff] %v1217_v61 }
 0x1e7   :  { %v1189_v45 = vpop.f32.mrf.mxu2  ;;  %v1218_v7 = vpop.f32.mrf.mxu3 }
 0x1e8   :  { %v1219_v46 = vadd.f32 %v1218_v7, %v1189_v45 }
 0x1ea   :  { %1274 = vst [vmem:[%s2403_s2 + $0x68] sm:$0xff] %v1219_v46 }
 0x203   :  { %v1192_v5 = vpop.f32.mrf.mxu2  ;;  %v1221_v47 = vpop.f32.mrf.mxu3 }
 0x204   :  { %v1222_v44 = vadd.f32 %v1221_v47, %v1192_v5 }
 0x206   :  { %1275 = vst [vmem:[%s2403_s2 + $0x70] sm:$0xff] %v1222_v44 }
 0x20b   :  { %v1194_v50 = vpop.f32.mrf.mxu2  ;;  %v1223_v54 = vpop.f32.mrf.mxu3 }
 0x20c   :  { %v1224_v43 = vadd.f32 %v1223_v54, %v1194_v50 }
 0x20e   :  { %1276 = vst [vmem:[%s2403_s2 + $0x78] sm:$0xff] %v1224_v43 }

</bundles_post_ra>
